<compile_context>
chip_gen: v6e
topology: v6e:2x2x1
jax: 0.10.0
libtpu: 0.0.40
codegen_flags: <defaults>
</compile_context>

<pallas_src>
import math

import jax
import jax.numpy as jnp
from jax.experimental import pallas as pl
from jax.experimental.pallas import tpu as pltpu


LAYER_SIZES = [784, 520, 320, 240, 120, 10]
OUT_PADDED = 128          # lane-dense final store (pad 10 -> 128)
MAX_M_TILE = 512          # batch-tile cap; fits all generations' VMEM budgets


def _round_up(x, m):
    return ((x + m - 1) // m) * m


def mlp_kernel(x_ref,
               w1_ref, b1_ref,
               w2_ref, b2_ref,
               w3_ref, b3_ref,
               w4_ref, b4_ref,
               w5_ref, b5_ref,
               o_ref):
    """Fused 5-layer MLP on one (M_TILE, 784) batch tile.

    bf16 activations/weights on the MXU, f32 accumulation + bias + ReLU,
    re-cast to bf16 between layers. Final layer writes a lane-dense
    (M_TILE, 128) f32 block (columns 10..127 are zero-padded weights).
    """
    h = x_ref[...]  # bf16 (m_tile, 784)
    for w_ref, b_ref in ((w1_ref, b1_ref), (w2_ref, b2_ref),
                         (w3_ref, b3_ref), (w4_ref, b4_ref)):
        h = jnp.dot(h, w_ref[...], preferred_element_type=jnp.float32) + b_ref[...]
        h = jnp.maximum(h, 0.0).astype(jnp.bfloat16)

    # Final layer: no activation (logits for softmax/cross-entropy outside).
    o_ref[...] = (jnp.dot(h, w5_ref[...], preferred_element_type=jnp.float32)
                  + b5_ref[...])


def init_params(key):
    """Init matching torch.nn.Linear's U(-1/sqrt(in), 1/sqrt(in)).

    Weights stored as (in, out) bf16 so the kernel computes x @ W;
    biases stored as (1, out) f32. The last layer is zero-padded to
    OUT_PADDED output columns for a lane-dense final store.
    """
    params = []
    n_layers = len(LAYER_SIZES) - 1
    for i in range(n_layers):
        fan_in, fan_out = LAYER_SIZES[i], LAYER_SIZES[i + 1]
        key, kw, kb = jax.random.split(key, 3)
        bound = 1.0 / math.sqrt(fan_in)
        w = jax.random.uniform(kw, (fan_in, fan_out), jnp.float32, -bound, bound)
        b = jax.random.uniform(kb, (1, fan_out), jnp.float32, -bound, bound)
        if i == n_layers - 1:
            w = jnp.pad(w, ((0, 0), (0, OUT_PADDED - fan_out)))
            b = jnp.pad(b, ((0, 0), (0, OUT_PADDED - fan_out)))
        params.append((w.astype(jnp.bfloat16), b.astype(jnp.float32)))
    return params


def net_forward(x_nchw, params):
    """Flatten NCHW -> (B, 784), pad the batch, run one fused Pallas call."""
    in_dim = LAYER_SIZES[0]
    out_dim = LAYER_SIZES[-1]

    x2d = jnp.reshape(x_nchw, (-1, in_dim)).astype(jnp.bfloat16)
    batch = x2d.shape[0]

    # Batch tile: multiple of 8 sublanes, capped so VMEM fits on all chips.
    m_tile = min(MAX_M_TILE, _round_up(batch, 8))
    b_pad = _round_up(batch, m_tile)
    if b_pad != batch:
        x2d = jnp.pad(x2d, ((0, b_pad - batch), (0, 0)))
    grid = (b_pad // m_tile,)

    flat_params = []
    for w, b in params:
        flat_params.extend([w, b])

    # Input/output tiles move with the grid; params are resident (same block
    # every step -> loaded into VMEM once).
    in_specs = [pl.BlockSpec((m_tile, in_dim), lambda i: (i, 0))]
    for p in flat_params:
        in_specs.append(pl.BlockSpec(p.shape, lambda i: (0, 0)))
    out_specs = pl.BlockSpec((m_tile, OUT_PADDED), lambda i: (i, 0))

    # Advisory cost hint for XLA's scheduler.
    flops = 2 * b_pad * sum(LAYER_SIZES[i] * LAYER_SIZES[i + 1]
                            for i in range(len(LAYER_SIZES) - 1))
    bytes_accessed = (x2d.size * 2
                      + sum(int(p.size) * p.dtype.itemsize for p in flat_params)
                      + b_pad * OUT_PADDED * 4)
    cost = pl.CostEstimate(flops=flops, transcendentals=0,
                           bytes_accessed=bytes_accessed)

    out_padded = pl.pallas_call(
        mlp_kernel,
        out_shape=jax.ShapeDtypeStruct((b_pad, OUT_PADDED), jnp.float32),
        grid=grid,
        in_specs=in_specs,
        out_specs=out_specs,
        compiler_params=pltpu.CompilerParams(
            dimension_semantics=("parallel",),
            vmem_limit_bytes=32 * 1024 * 1024,
        ),
        cost_estimate=cost,
    )(x2d, *flat_params)

    return out_padded[:batch, :out_dim]


def net_forward_ref(x_nchw, params):
    """Pure-JAX reference with identical numerics (bf16 inputs, f32 accum)."""
    h = jnp.reshape(x_nchw, (-1, LAYER_SIZES[0])).astype(jnp.bfloat16)
    for i, (w, b) in enumerate(params):
        h = jnp.dot(h, w, preferred_element_type=jnp.float32) + b
        if i < len(params) - 1:
            h = jnp.maximum(h, 0.0).astype(jnp.bfloat16)
    return h[:, :LAYER_SIZES[-1]]


if __name__ == "__main__":
    key = jax.random.PRNGKey(0)
    key, kx = jax.random.split(key)

    # MNIST-like NCHW input at small batch.
    batch = 2
    x = jax.random.normal(kx, (batch, 1, 28, 28), jnp.float32)

    params = init_params(key)

    out = net_forward(x, params)
    out = jax.block_until_ready(out)

    ref = net_forward_ref(x, params)
    assert out.shape == (batch, 10), out.shape
    # bf16 matmul inputs -> loosened tolerance vs. the original f32-only check.
    assert jnp.allclose(out, ref, atol=2e-2, rtol=2e-2), (
        f"max abs err {jnp.max(jnp.abs(out - ref))}"
    )

    print("KERNEL_OK")
</pallas_src>

<mosaic_0001>
module attributes {stable_mosaic.version = 11 : i64} {
  func.func @mlp_kernel(%arg0: i32, %arg1: memref<8x784xbf16, #tpu.memory_space<vmem>>, %arg2: memref<784x520xbf16, #tpu.memory_space<vmem>>, %arg3: memref<1x520xf32, #tpu.memory_space<vmem>>, %arg4: memref<520x320xbf16, #tpu.memory_space<vmem>>, %arg5: memref<1x320xf32, #tpu.memory_space<vmem>>, %arg6: memref<320x240xbf16, #tpu.memory_space<vmem>>, %arg7: memref<1x240xf32, #tpu.memory_space<vmem>>, %arg8: memref<240x120xbf16, #tpu.memory_space<vmem>>, %arg9: memref<1x120xf32, #tpu.memory_space<vmem>>, %arg10: memref<120x128xbf16, #tpu.memory_space<vmem>>, %arg11: memref<1x128xf32, #tpu.memory_space<vmem>>, %arg12: memref<8x128xf32, #tpu.memory_space<vmem>>) attributes {dimension_semantics = [#tpu.dimension_semantics<parallel>], iteration_bounds = array<i64: 1>, scalar_prefetch = 0 : i64, scratch_operands = 0 : i64, tpu.core_type = #tpu.core_type<tc>, window_params = [{transform_indices = @transform_0, window_bounds = array<i64: 8, 784>}, {pipeline_mode = #tpu.pipeline_mode<synchronous>, transform_indices = @transform_1, window_bounds = array<i64: 784, 520>}, {pipeline_mode = #tpu.pipeline_mode<synchronous>, transform_indices = @transform_2, window_bounds = array<i64: 1, 520>}, {pipeline_mode = #tpu.pipeline_mode<synchronous>, transform_indices = @transform_3, window_bounds = array<i64: 520, 320>}, {pipeline_mode = #tpu.pipeline_mode<synchronous>, transform_indices = @transform_4, window_bounds = array<i64: 1, 320>}, {pipeline_mode = #tpu.pipeline_mode<synchronous>, transform_indices = @transform_5, window_bounds = array<i64: 320, 240>}, {pipeline_mode = #tpu.pipeline_mode<synchronous>, transform_indices = @transform_6, window_bounds = array<i64: 1, 240>}, {pipeline_mode = #tpu.pipeline_mode<synchronous>, transform_indices = @transform_7, window_bounds = array<i64: 240, 120>}, {pipeline_mode = #tpu.pipeline_mode<synchronous>, transform_indices = @transform_8, window_bounds = array<i64: 1, 120>}, {pipeline_mode = #tpu.pipeline_mode<synchronous>, transform_indices = @transform_9, window_bounds = array<i64: 120, 128>}, {pipeline_mode = #tpu.pipeline_mode<synchronous>, transform_indices = @transform_10, window_bounds = array<i64: 1, 128>}, {transform_indices = @transform_11, window_bounds = array<i64: 8, 128>}]} {
    %c0 = arith.constant 0 : index
    %c0_0 = arith.constant 0 : index
    %0 = vector.load %arg1[%c0, %c0_0] : memref<8x784xbf16, #tpu.memory_space<vmem>>, vector<8x784xbf16>
    %c0_1 = arith.constant 0 : index
    %c0_2 = arith.constant 0 : index
    %1 = vector.load %arg2[%c0_1, %c0_2] : memref<784x520xbf16, #tpu.memory_space<vmem>>, vector<784x520xbf16>
    %cst = arith.constant dense<0.000000e+00> : vector<8x520xf32>
    %2 = tpu.matmul %0, %1, %cst {dimension_numbers = #tpu.dot_dimension_numbers<[1], [0], [0], [1], [0, 0, 1, 1], [], []>} : vector<8x784xbf16>, vector<784x520xbf16>, vector<8x520xf32> -> vector<8x520xf32>
    %c0_3 = arith.constant 0 : index
    %c0_4 = arith.constant 0 : index
    %3 = vector.load %arg3[%c0_3, %c0_4] : memref<1x520xf32, #tpu.memory_space<vmem>>, vector<1x520xf32>
    %4 = vector.broadcast %3 : vector<1x520xf32> to vector<8x520xf32>
    %5 = arith.addf %2, %4 : vector<8x520xf32>
    %cst_5 = arith.constant 0.000000e+00 : f32
    %6 = vector.broadcast %cst_5 : f32 to vector<8x520xf32>
    %7 = arith.maximumf %5, %6 : vector<8x520xf32>
    %8 = arith.truncf %7 : vector<8x520xf32> to vector<8x520xbf16>
    %c0_6 = arith.constant 0 : index
    %c0_7 = arith.constant 0 : index
    %9 = vector.load %arg4[%c0_6, %c0_7] : memref<520x320xbf16, #tpu.memory_space<vmem>>, vector<520x320xbf16>
    %cst_8 = arith.constant dense<0.000000e+00> : vector<8x320xf32>
    %10 = tpu.matmul %8, %9, %cst_8 {dimension_numbers = #tpu.dot_dimension_numbers<[1], [0], [0], [1], [0, 0, 1, 1], [], []>} : vector<8x520xbf16>, vector<520x320xbf16>, vector<8x320xf32> -> vector<8x320xf32>
    %c0_9 = arith.constant 0 : index
    %c0_10 = arith.constant 0 : index
    %11 = vector.load %arg5[%c0_9, %c0_10] : memref<1x320xf32, #tpu.memory_space<vmem>>, vector<1x320xf32>
    %12 = vector.broadcast %11 : vector<1x320xf32> to vector<8x320xf32>
    %13 = arith.addf %10, %12 : vector<8x320xf32>
    %cst_11 = arith.constant 0.000000e+00 : f32
    %14 = vector.broadcast %cst_11 : f32 to vector<8x320xf32>
    %15 = arith.maximumf %13, %14 : vector<8x320xf32>
    %16 = arith.truncf %15 : vector<8x320xf32> to vector<8x320xbf16>
    %c0_12 = arith.constant 0 : index
    %c0_13 = arith.constant 0 : index
    %17 = vector.load %arg6[%c0_12, %c0_13] : memref<320x240xbf16, #tpu.memory_space<vmem>>, vector<320x240xbf16>
    %cst_14 = arith.constant dense<0.000000e+00> : vector<8x240xf32>
    %18 = tpu.matmul %16, %17, %cst_14 {dimension_numbers = #tpu.dot_dimension_numbers<[1], [0], [0], [1], [0, 0, 1, 1], [], []>} : vector<8x320xbf16>, vector<320x240xbf16>, vector<8x240xf32> -> vector<8x240xf32>
    %c0_15 = arith.constant 0 : index
    %c0_16 = arith.constant 0 : index
    %19 = vector.load %arg7[%c0_15, %c0_16] : memref<1x240xf32, #tpu.memory_space<vmem>>, vector<1x240xf32>
    %20 = vector.broadcast %19 : vector<1x240xf32> to vector<8x240xf32>
    %21 = arith.addf %18, %20 : vector<8x240xf32>
    %cst_17 = arith.constant 0.000000e+00 : f32
    %22 = vector.broadcast %cst_17 : f32 to vector<8x240xf32>
    %23 = arith.maximumf %21, %22 : vector<8x240xf32>
    %24 = arith.truncf %23 : vector<8x240xf32> to vector<8x240xbf16>
    %c0_18 = arith.constant 0 : index
    %c0_19 = arith.constant 0 : index
    %25 = vector.load %arg8[%c0_18, %c0_19] : memref<240x120xbf16, #tpu.memory_space<vmem>>, vector<240x120xbf16>
    %cst_20 = arith.constant dense<0.000000e+00> : vector<8x120xf32>
    %26 = tpu.matmul %24, %25, %cst_20 {dimension_numbers = #tpu.dot_dimension_numbers<[1], [0], [0], [1], [0, 0, 1, 1], [], []>} : vector<8x240xbf16>, vector<240x120xbf16>, vector<8x120xf32> -> vector<8x120xf32>
    %c0_21 = arith.constant 0 : index
    %c0_22 = arith.constant 0 : index
    %27 = vector.load %arg9[%c0_21, %c0_22] : memref<1x120xf32, #tpu.memory_space<vmem>>, vector<1x120xf32>
    %28 = vector.broadcast %27 : vector<1x120xf32> to vector<8x120xf32>
    %29 = arith.addf %26, %28 : vector<8x120xf32>
    %cst_23 = arith.constant 0.000000e+00 : f32
    %30 = vector.broadcast %cst_23 : f32 to vector<8x120xf32>
    %31 = arith.maximumf %29, %30 : vector<8x120xf32>
    %32 = arith.truncf %31 : vector<8x120xf32> to vector<8x120xbf16>
    %c0_24 = arith.constant 0 : index
    %c0_25 = arith.constant 0 : index
    %33 = vector.load %arg10[%c0_24, %c0_25] : memref<120x128xbf16, #tpu.memory_space<vmem>>, vector<120x128xbf16>
    %cst_26 = arith.constant dense<0.000000e+00> : vector<8x128xf32>
    %34 = tpu.matmul %32, %33, %cst_26 {dimension_numbers = #tpu.dot_dimension_numbers<[1], [0], [0], [1], [0, 0, 1, 1], [], []>} : vector<8x120xbf16>, vector<120x128xbf16>, vector<8x128xf32> -> vector<8x128xf32>
    %c0_27 = arith.constant 0 : index
    %c0_28 = arith.constant 0 : index
    %35 = vector.load %arg11[%c0_27, %c0_28] : memref<1x128xf32, #tpu.memory_space<vmem>>, vector<1x128xf32>
    %36 = vector.broadcast %35 : vector<1x128xf32> to vector<8x128xf32>
    %37 = arith.addf %34, %36 : vector<8x128xf32>
    %c0_29 = arith.constant 0 : index
    %c0_30 = arith.constant 0 : index
    %38 = vector.load %arg12[%c0_29, %c0_30] : memref<8x128xf32, #tpu.memory_space<vmem>>, vector<8x128xf32>
    tpu.vector_store %arg12[%c0_29, %c0_30], %37 {strides = array<i32>} : memref<8x128xf32, #tpu.memory_space<vmem>>, vector<8x128xf32>,
    return
  }
  func.func @transform_0(%arg0: i32) -> (i32, i32) {
    %c0_i32 = arith.constant 0 : i32
    %c0_i32_0 = arith.constant 0 : i32
    return %arg0, %c0_i32 : i32, i32
  }
  func.func @transform_1(%arg0: i32) -> (i32, i32) {
    %c0_i32 = arith.constant 0 : i32
    %c0_i32_0 = arith.constant 0 : i32
    %c0_i32_1 = arith.constant 0 : i32
    return %c0_i32, %c0_i32_0 : i32, i32
  }
  func.func @transform_2(%arg0: i32) -> (i32, i32) {
    %c0_i32 = arith.constant 0 : i32
    %c0_i32_0 = arith.constant 0 : i32
    %c0_i32_1 = arith.constant 0 : i32
    return %c0_i32, %c0_i32_0 : i32, i32
  }
  func.func @transform_3(%arg0: i32) -> (i32, i32) {
    %c0_i32 = arith.constant 0 : i32
    %c0_i32_0 = arith.constant 0 : i32
    %c0_i32_1 = arith.constant 0 : i32
    return %c0_i32, %c0_i32_0 : i32, i32
  }
  func.func @transform_4(%arg0: i32) -> (i32, i32) {
    %c0_i32 = arith.constant 0 : i32
    %c0_i32_0 = arith.constant 0 : i32
    %c0_i32_1 = arith.constant 0 : i32
    return %c0_i32, %c0_i32_0 : i32, i32
  }
  func.func @transform_5(%arg0: i32) -> (i32, i32) {
    %c0_i32 = arith.constant 0 : i32
    %c0_i32_0 = arith.constant 0 : i32
    %c0_i32_1 = arith.constant 0 : i32
    return %c0_i32, %c0_i32_0 : i32, i32
  }
  func.func @transform_6(%arg0: i32) -> (i32, i32) {
    %c0_i32 = arith.constant 0 : i32
    %c0_i32_0 = arith.constant 0 : i32
    %c0_i32_1 = arith.constant 0 : i32
    return %c0_i32, %c0_i32_0 : i32, i32
  }
  func.func @transform_7(%arg0: i32) -> (i32, i32) {
    %c0_i32 = arith.constant 0 : i32
    %c0_i32_0 = arith.constant 0 : i32
    %c0_i32_1 = arith.constant 0 : i32
    return %c0_i32, %c0_i32_0 : i32, i32
  }
  func.func @transform_8(%arg0: i32) -> (i32, i32) {
    %c0_i32 = arith.constant 0 : i32
    %c0_i32_0 = arith.constant 0 : i32
    %c0_i32_1 = arith.constant 0 : i32
    return %c0_i32, %c0_i32_0 : i32, i32
  }
  func.func @transform_9(%arg0: i32) -> (i32, i32) {
    %c0_i32 = arith.constant 0 : i32
    %c0_i32_0 = arith.constant 0 : i32
    %c0_i32_1 = arith.constant 0 : i32
    return %c0_i32, %c0_i32_0 : i32, i32
  }
  func.func @transform_10(%arg0: i32) -> (i32, i32) {
    %c0_i32 = arith.constant 0 : i32
    %c0_i32_0 = arith.constant 0 : i32
    %c0_i32_1 = arith.constant 0 : i32
    return %c0_i32, %c0_i32_0 : i32, i32
  }
  func.func @transform_11(%arg0: i32) -> (i32, i32) {
    %c0_i32 = arith.constant 0 : i32
    %c0_i32_0 = arith.constant 0 : i32
    return %arg0, %c0_i32 : i32, i32
  }
}

</mosaic_0001>

<bundles_post_ra>
// kernel: tpu_custom_call.1
= control target key start
LH: loop header
LB: loop body
LE: loop exit
PB: predicated region body
PF: predicated region fallthrough
CT: control target
= control target key end

     0   :  { %vm1663_vm0 = vcmask 130048   ;;  %vm4911_vm1 = vmmov 0   ;;  %s6354_s0 = inlined_call_operand.vmem [shape: bf16[8,784], index: 0, kind: input, shape index: {}]   ;;  %s6355_s1 = inlined_call_operand.vmem [shape: bf16[784,520], index: 1, kind: input, shape index: {}]   ;;  %s6356_s2 = inlined_call_operand.vmem [shape: f32[1,520], index: 2, kind: input, shape index: {}]   ;;  %s6357_s3 = inlined_call_operand.vmem [shape: bf16[520,320], index: 3, kind: input, shape index: {}]   ;;  %s6358_s4 = inlined_call_operand.vmem [shape: f32[1,320], index: 4, kind: input, shape index: {}]   ;;  %s6359_s5 = inlined_call_operand.vmem [shape: bf16[320,240], index: 5, kind: input, shape index: {}]   ;;  %s6360_s6 = inlined_call_operand.vmem [shape: f32[1,240], index: 6, kind: input, shape index: {}]   ;;  %s6361_s7 = inlined_call_operand.vmem [shape: bf16[240,120], index: 7, kind: input, shape index: {}]   ;;  %s6362_s8 = inlined_call_operand.vmem [shape: f32[1,120], index: 8, kind: input, shape index: {}]   ;;  %s6363_s9 = inlined_call_operand.vmem [shape: bf16[120,128], index: 9, kind: input, shape index: {}]   ;;  %s6364_s10 = inlined_call_operand.vmem [shape: f32[1,128], index: 10, kind: input, shape index: {}]   ;;  %s6365_s11 = inlined_call_operand.hbm [shape: f32[8,128], index: 11, kind: output, shape index: {}]  }
   0x1   :  { %v4323_v0 = vld [vmem:[%s6355_s1 + $0x11c] ss:$20 sps:$4 sm:$0xff]   ;;  %v4325_v1 = vld [vmem:[%s6355_s1 + $0x118] ss:$20 sps:$4 sm:$0xff]   ;;  %v4329_v4 = vld [vmem:[%s6355_s1 + $0xf4] ss:$20 sps:$4 sm:$0xff]  }
   0x2   :  { %1667 = vmatprep.subr.bf16.mxu0 %v4323_v0  ;;  %v4326_v2 = vld [vmem:[%s6355_s1 + $0x39c] ss:$20 sps:$4 sm:$0xff]   ;;  %v4328_v3 = vld [vmem:[%s6355_s1 + $0x398] ss:$20 sps:$4 sm:$0xff]   ;;  %v4332_v6 = vld [vmem:[%s6355_s1 + $0x374] ss:$20 sps:$4 sm:$0xff]  }
   0x3   :  { %1668 = vmatpush1.bf16.msra.mxu0 %v4325_v1  ;;  %v4331_v5 = vld [vmem:[%s6355_s1 + $0xf0] ss:$20 sps:$4 sm:$0xff]   ;;  %1708 = vmatprep.subr.bf16.mxu1 %v4326_v2  ;;  %v4335_v8 = vld [vmem:[%s6355_s1 + $0xcc] ss:$20 sps:$4 sm:$0xff]   ;;  %v4337_v9 = vld [vmem:[%s6355_s1 + $0xc8] ss:$20 sps:$4 sm:$0xff]  }
   0x4   :  { %1709 = vmatpush1.bf16.msra.mxu1 %v4328_v3  ;;  %1669 = vmatprep.subr.bf16.mxu0 %v4329_v4  ;;  %v4334_v7 = vld [vmem:[%s6355_s1 + $0x370] ss:$20 sps:$4 sm:$0xff]   ;;  %v4338_v10 = vld [vmem:[%s6355_s1 + $0x34c] ss:$20 sps:$4 sm:$0xff]   ;;  %v4340_v12 = vld [vmem:[%s6355_s1 + $0x348] ss:$20 sps:$4 sm:$0xff]  }
   0x5   :  { %1710 = vmatprep.subr.bf16.mxu1 %v4332_v6  ;;  %v4341_v11 = vld [vmem:[%s6355_s1 + $0xa4] ss:$20 sps:$4 sm:$0xff]   ;;  %v4343_v14 = vld [vmem:[%s6355_s1 + $0xa0] ss:$20 sps:$4 sm:$0xff]   ;;  %v4347_v15 = vld [vmem:[%s6355_s1 + $0x7c] ss:$20 sps:$4 sm:$0xff]  }
   0x6   :  { %v4344_v13 = vld [vmem:[%s6355_s1 + $0x324] ss:$20 sps:$4 sm:$0xff]   ;;  %v4346_v16 = vld [vmem:[%s6355_s1 + $0x320] ss:$20 sps:$4 sm:$0xff]   ;;  %v4350_v17 = vld [vmem:[%s6355_s1 + $0x2fc] ss:$20 sps:$4 sm:$0xff]  }
   0x7   :  { %1670 = vmatpush1.bf16.msra.mxu0 %v4331_v5  ;;  %v4349_v18 = vld [vmem:[%s6355_s1 + $0x78] ss:$20 sps:$4 sm:$0xff]   ;;  %v4353_v19 = vld [vmem:[%s6355_s1 + $0x54] ss:$20 sps:$4 sm:$0xff]   ;;  %v4355_v22 = vld [vmem:[%s6355_s1 + $0x50] ss:$20 sps:$4 sm:$0xff]  }
   0x8   :  { %1671 = vmatprep.subr.bf16.mxu0 %v4335_v8  ;;  %1711 = vmatpush1.bf16.msra.mxu1 %v4334_v7  ;;  %v4352_v20 = vld [vmem:[%s6355_s1 + $0x2f8] ss:$20 sps:$4 sm:$0xff]   ;;  %v4356_v21 = vld [vmem:[%s6355_s1 + $0x2d4] ss:$20 sps:$4 sm:$0xff]   ;;  %v4358_v24 = vld [vmem:[%s6355_s1 + $0x2d0] ss:$20 sps:$4 sm:$0xff]  }
   0x9   :  { %1712 = vmatprep.subr.bf16.mxu1 %v4338_v10  ;;  %v4359_v23 = vld [vmem:[%s6355_s1 + $0x2c] ss:$20 sps:$4 sm:$0xff]   ;;  %v4361_v26 = vld [vmem:[%s6355_s1 + $0x28] ss:$20 sps:$4 sm:$0xff]   ;;  %v4365_v27 = vld [vmem:[%s6355_s1 + $0x4] ss:$20 sps:$4 sm:$0xff]  }
   0xa   :  { %v4362_v25 = vld [vmem:[%s6355_s1 + $0x2ac] ss:$20 sps:$4 sm:$0xff]   ;;  %v4364_v28 = vld [vmem:[%s6355_s1 + $0x2a8] ss:$20 sps:$4 sm:$0xff]   ;;  %v4368_v29 = vld [vmem:[%s6355_s1 + $0x284] ss:$20 sps:$4 sm:$0xff]  }
   0xb   :  { %1672 = vmatpush1.bf16.msra.mxu0 %v4337_v9  ;;  %v4367_v30 = vld [vmem:[%s6355_s1] ss:$20 sps:$4 sm:$0xff]   ;;  %v4371_v31 = vld [vmem:[%s6355_s1 + $0x25c] ss:$20 sps:$4 sm:$0xff]   ;;  %v4373_v34 = vld [vmem:[%s6355_s1 + $0x258] ss:$20 sps:$4 sm:$0xff]  }
   0xc   :  { %1673 = vmatprep.subr.bf16.mxu0 %v4341_v11  ;;  %1713 = vmatpush1.bf16.msra.mxu1 %v4340_v12  ;;  %v4370_v32 = vld [vmem:[%s6355_s1 + $0x280] ss:$20 sps:$4 sm:$0xff]   ;;  %v4374_v33 = vld [vmem:[%s6355_s1 + $0x4dc] ss:$20 sps:$4 sm:$0xff]   ;;  %v4376_v36 = vld [vmem:[%s6355_s1 + $0x4d8] ss:$20 sps:$4 sm:$0xff]  }
   0xd   :  { %1714 = vmatprep.subr.bf16.mxu1 %v4344_v13  ;;  %v4377_v35 = vld [vmem:[%s6355_s1 + $0x234] ss:$20 sps:$4 sm:$0xff]   ;;  %v4379_v38 = vld [vmem:[%s6355_s1 + $0x230] ss:$20 sps:$4 sm:$0xff]   ;;  %v4383_v39 = vld [vmem:[%s6355_s1 + $0x20c] ss:$20 sps:$4 sm:$0xff]  }
   0xe   :  { %v4380_v37 = vld [vmem:[%s6355_s1 + $0x4b4] ss:$20 sps:$4 sm:$0xff]   ;;  %v4382_v40 = vld [vmem:[%s6355_s1 + $0x4b0] ss:$20 sps:$4 sm:$0xff]   ;;  %v4386_v41 = vld [vmem:[%s6355_s1 + $0x48c] ss:$20 sps:$4 sm:$0xff]  }
   0xf   :  { %1674 = vmatpush1.bf16.msra.mxu0 %v4343_v14  ;;  %v4385_v42 = vld [vmem:[%s6355_s1 + $0x208] ss:$20 sps:$4 sm:$0xff]   ;;  %v4389_v43 = vld [vmem:[%s6355_s1 + $0x1e4] ss:$20 sps:$4 sm:$0xff]   ;;  %v4391_v47 = vld [vmem:[%s6355_s1 + $0x1e0] ss:$20 sps:$4 sm:$0xff]  }
  0x10   :  { %1675 = vmatprep.subr.bf16.mxu0 %v4347_v15  ;;  %1715 = vmatpush1.bf16.msra.mxu1 %v4346_v16  ;;  %v4388_v44 = vld [vmem:[%s6355_s1 + $0x488] ss:$20 sps:$4 sm:$0xff]   ;;  %v4392_v45 = vld [vmem:[%s6355_s1 + $0x464] ss:$20 sps:$4 sm:$0xff]   ;;  %v4394_v51 = vld [vmem:[%s6355_s1 + $0x460] ss:$20 sps:$4 sm:$0xff]  }
  0x11   :  { %1716 = vmatprep.subr.bf16.mxu1 %v4350_v17  ;;  %v40_v46 = vld [vmem:[%s6354_s0] sm:$0xff]  ;;  %v4395_v49 = vld [vmem:[%s6355_s1 + $0x1bc] ss:$20 sps:$4 sm:$0xff]   ;;  %v41_v50 = vld [vmem:[%s6354_s0 + $0x8] sm:$0xff] }
  0x12   :  { %v5117_v48 = vcombine.high %v40_v46, %v40_v46  ;;  %v5129_v52 = vcombine.high %v41_v50, %v41_v50  ;;  %v4398_v53 = vld [vmem:[%s6355_s1 + $0x43c] ss:$20 sps:$4 sm:$0xff]   ;;  %v4397_v54 = vld [vmem:[%s6355_s1 + $0x1b8] ss:$20 sps:$4 sm:$0xff]   ;;  %v4401_v55 = vld [vmem:[%s6355_s1 + $0x194] ss:$20 sps:$4 sm:$0xff]   ;;  %v5180_v5 = vcombine.low %v40_v46, %v40_v46  ;;  %v5188_v8 = vcombine.low %v41_v50, %v41_v50 }
  0x13   :  { %1676 = vmatpush1.bf16.msra.mxu0 %v4349_v18  ;;  %v4400_v56 = vld [vmem:[%s6355_s1 + $0x438] ss:$20 sps:$4 sm:$0xff]   ;;  %v4404_v57 = vld [vmem:[%s6355_s1 + $0x414] ss:$20 sps:$4 sm:$0xff]   ;;  %v4403_v58 = vld [vmem:[%s6355_s1 + $0x190] ss:$20 sps:$4 sm:$0xff]  }
  0x14   :  { %1677 = vmatprep.subr.bf16.mxu0 %v4353_v19  ;;  %1717 = vmatpush1.bf16.msra.mxu1 %v4352_v20  ;;  %v4407_v59 = vld [vmem:[%s6355_s1 + $0x16c] ss:$20 sps:$4 sm:$0xff]   ;;  %v4406_v60 = vld [vmem:[%s6355_s1 + $0x410] ss:$20 sps:$4 sm:$0xff]   ;;  %v4409_v62 = vld [vmem:[%s6355_s1 + $0x168] ss:$20 sps:$4 sm:$0xff]  }
  0x15   :  { %1718 = vmatprep.subr.bf16.mxu1 %v4356_v21  ;;  %1699 = vmatprep.mubr.bf16.mxu0 %v5117_v48  ;;  %v4410_v61 = vld [vmem:[%s6355_s1 + $0x3ec] ss:$20 sps:$4 sm:$0xff]   ;;  %v4413_v63 = vld [vmem:[%s6355_s1 + $0x144] ss:$20 sps:$4 sm:$0xff]   ;;  %v4412_v0 = vld [vmem:[%s6355_s1 + $0x3e8] ss:$20 sps:$4 sm:$0xff]  }
  0x16   :  { %1740 = vmatprep.mubr.bf16.mxu1 %v5129_v52  ;;  %v4416_v1 = vld [vmem:[%s6355_s1 + $0x3c4] ss:$20 sps:$4 sm:$0xff]   ;;  %v4415_v2 = vld [vmem:[%s6355_s1 + $0x140] ss:$20 sps:$4 sm:$0xff]   ;;  %v4423_v3 = vld [vmem:[%s6355_s1 + $0x61c] ss:$20 sps:$4 sm:$0xff]  }
  0x17   :  { %1678 = vmatpush1.bf16.msra.mxu0 %v4355_v22  ;;  %v4419_v4 = vld [vmem:[%s6355_s1 + $0x3c0] ss:$20 sps:$4 sm:$0xff]   ;;  %v4434_v6 = vld [vmem:[%s6355_s1 + $0x124] ss:$20 sps:$4 sm:$0xff]   ;;  %v4440_v11 = vld [vmem:[%s6355_s1 + $0xfc] ss:$20 sps:$4 sm:$0xff]  }
  0x18   :  { %1679 = vmatprep.subr.bf16.mxu0 %v4359_v23  ;;  %1719 = vmatpush1.bf16.msra.mxu1 %v4358_v24  ;;  %v4421_v7 = vld [vmem:[%s6355_s1 + $0x618] ss:$20 sps:$4 sm:$0xff]   ;;  %v4428_v9 = vld [vmem:[%s6355_s1 + $0x5f4] ss:$20 sps:$4 sm:$0xff]   ;;  %v4426_v12 = vld [vmem:[%s6355_s1 + $0x5f0] ss:$20 sps:$4 sm:$0xff]  }
  0x19   :  { %1720 = vmatprep.subr.bf16.mxu1 %v4362_v25  ;;  %v4432_v10 = vld [vmem:[%s6355_s1 + $0x120] ss:$20 sps:$4 sm:$0xff]   ;;  %v4438_v14 = vld [vmem:[%s6355_s1 + $0xf8] ss:$20 sps:$4 sm:$0xff]   ;;  %v4429_v16 = vld [vmem:[%s6355_s1 + $0x5c8] ss:$20 sps:$4 sm:$0xff]  }
  0x1a   :  { %v4431_v13 = vld [vmem:[%s6355_s1 + $0x5cc] ss:$20 sps:$4 sm:$0xff]   ;;  %v4446_v15 = vld [vmem:[%s6355_s1 + $0xd4] ss:$20 sps:$4 sm:$0xff]   ;;  %v4437_v17 = vld [vmem:[%s6355_s1 + $0x5a4] ss:$20 sps:$4 sm:$0xff]  }
  0x1b   :  { %1680 = vmatpush1.bf16.msra.mxu0 %v4361_v26  ;;  %v4444_v18 = vld [vmem:[%s6355_s1 + $0xd0] ss:$20 sps:$4 sm:$0xff]   ;;  %v4452_v19 = vld [vmem:[%s6355_s1 + $0xac] ss:$20 sps:$4 sm:$0xff]   ;;  %v4450_v22 = vld [vmem:[%s6355_s1 + $0xa8] ss:$20 sps:$4 sm:$0xff]  }
  0x1c   :  { %1681 = vmatprep.subr.bf16.mxu0 %v4365_v27  ;;  %1721 = vmatpush1.bf16.msra.mxu1 %v4364_v28  ;;  %v4435_v20 = vld [vmem:[%s6355_s1 + $0x5a0] ss:$20 sps:$4 sm:$0xff]   ;;  %v4443_v21 = vld [vmem:[%s6355_s1 + $0x57c] ss:$20 sps:$4 sm:$0xff]   ;;  %v4458_v23 = vld [vmem:[%s6355_s1 + $0x84] ss:$20 sps:$4 sm:$0xff]  }
  0x1d   :  { %1722 = vmatprep.subr.bf16.mxu1 %v4368_v29  ;;  %v4441_v24 = vld [vmem:[%s6355_s1 + $0x578] ss:$20 sps:$4 sm:$0xff]   ;;  %v4449_v25 = vld [vmem:[%s6355_s1 + $0x554] ss:$20 sps:$4 sm:$0xff]   ;;  %v4464_v27 = vld [vmem:[%s6355_s1 + $0x5c] ss:$20 sps:$4 sm:$0xff]  }
  0x1e   :  { %v4456_v26 = vld [vmem:[%s6355_s1 + $0x80] ss:$20 sps:$4 sm:$0xff]   ;;  %v4447_v28 = vld [vmem:[%s6355_s1 + $0x550] ss:$20 sps:$4 sm:$0xff]  }
  0x1f   :  { %1682 = vmatpush1.bf16.msra.mxu0 %v4367_v30  ;;  %v5256_v29 = vld [vmem:[%s6354_s0 + $0x10] sm:$0xff]  ;;  %v4455_v30 = vld [vmem:[%s6355_s1 + $0x52c] ss:$20 sps:$4 sm:$0xff]  }
  0x20   :  { %1683 = vmatprep.subr.bf16.mxu0 %v4371_v31  ;;  %1723 = vmatpush1.bf16.msra.mxu1 %v4370_v32  ;;  %v5263_v31 = vcombine.high %v5256_v29, %v5256_v29  ;;  %v4462_v32 = vld [vmem:[%s6355_s1 + $0x58] ss:$20 sps:$4 sm:$0xff]   ;;  %v4471_v46 = vld [vmem:[%s6355_s1 + $0x730] ss:$20 sps:$4 sm:$0xff]   ;;  %v4494_v50 = vld [vmem:[%s6355_s1 + $0x214] ss:$20 sps:$4 sm:$0xff]  }
  0x21   :  { %1724 = vmatprep.subr.bf16.mxu1 %v4374_v33  ;;  %v4470_v33 = vld [vmem:[%s6355_s1 + $0x34] ss:$20 sps:$4 sm:$0xff]  }
  0x23   :  { %1684 = vmatpush2.bf16.msra.mxu0 %v4373_v34  ;;  %v4453_v34 = vld [vmem:[%s6355_s1 + $0x528] ss:$20 sps:$4 sm:$0xff]  }
  0x24   :  { %1685 = vmatprep.subr.bf16.mxu0 %v4377_v35  ;;  %1725 = vmatpush2.bf16.msra.mxu1 %v4376_v36  ;;  %v4461_v35 = vld [vmem:[%s6355_s1 + $0x504] ss:$20 sps:$4 sm:$0xff]  }
  0x25   :  { %1726 = vmatprep.subr.bf16.mxu1 %v4380_v37  ;;  %v4468_v36 = vld [vmem:[%s6355_s1 + $0x30] ss:$20 sps:$4 sm:$0xff]   ;;  %v4476_v37 = vld [vmem:[%s6355_s1 + $0xc] ss:$20 sps:$4 sm:$0xff]  }
  0x27   :  { %1686 = vmatpush2.bf16.msra.mxu0 %v4379_v38  ;;  %v4459_v38 = vld [vmem:[%s6355_s1 + $0x500] ss:$20 sps:$4 sm:$0xff]  }
  0x28   :  { %1687 = vmatprep.subr.bf16.mxu0 %v4383_v39  ;;  %1727 = vmatpush2.bf16.msra.mxu1 %v4382_v40  ;;  %v4467_v39 = vld [vmem:[%s6355_s1 + $0x75c] ss:$20 sps:$4 sm:$0xff]  }
  0x29   :  { %1728 = vmatprep.subr.bf16.mxu1 %v4386_v41  ;;  %v4474_v40 = vld [vmem:[%s6355_s1 + $0x8] ss:$20 sps:$4 sm:$0xff]   ;;  %v4482_v41 = vld [vmem:[%s6355_s1 + $0x264] ss:$20 sps:$4 sm:$0xff]  }
  0x2b   :  { %1688 = vmatpush2.bf16.msra.mxu0 %v4385_v42  ;;  %v4465_v42 = vld [vmem:[%s6355_s1 + $0x758] ss:$20 sps:$4 sm:$0xff]  }
  0x2c   :  { %1689 = vmatprep.subr.bf16.mxu0 %v4389_v43  ;;  %1729 = vmatpush2.bf16.msra.mxu1 %v4388_v44  ;;  %v4473_v43 = vld [vmem:[%s6355_s1 + $0x734] ss:$20 sps:$4 sm:$0xff]  }
  0x2d   :  { %1730 = vmatprep.subr.bf16.mxu1 %v4392_v45  ;;  %v4480_v44 = vld [vmem:[%s6355_s1 + $0x260] ss:$20 sps:$4 sm:$0xff]   ;;  %v4488_v45 = vld [vmem:[%s6355_s1 + $0x23c] ss:$20 sps:$4 sm:$0xff]  }
  0x2f   :  { %1690 = vmatpush2.bf16.msra.mxu0 %v4391_v47  ;;  %v4479_v47 = vld [vmem:[%s6355_s1 + $0x70c] ss:$20 sps:$4 sm:$0xff]  }
  0x30   :  { %1691 = vmatprep.subr.bf16.mxu0 %v4395_v49  ;;  %1731 = vmatpush2.bf16.msra.mxu1 %v4394_v51  ;;  %v4486_v49 = vld [vmem:[%s6355_s1 + $0x238] ss:$20 sps:$4 sm:$0xff]   ;;  %v4477_v51 = vld [vmem:[%s6355_s1 + $0x708] ss:$20 sps:$4 sm:$0xff]  }
  0x31   :  { %1732 = vmatprep.subr.bf16.mxu1 %v4398_v53  ;;  %v4485_v53 = vld [vmem:[%s6355_s1 + $0x6e4] ss:$20 sps:$4 sm:$0xff]  }
  0x33   :  { %1692 = vmatpush2.bf16.msra.mxu0 %v4397_v54  ;;  %v4492_v54 = vld [vmem:[%s6355_s1 + $0x210] ss:$20 sps:$4 sm:$0xff]  }
  0x34   :  { %1693 = vmatprep.subr.bf16.mxu0 %v4401_v55  ;;  %1733 = vmatpush2.bf16.msra.mxu1 %v4400_v56  ;;  %v4500_v55 = vld [vmem:[%s6355_s1 + $0x1ec] ss:$20 sps:$4 sm:$0xff]  }
  0x35   :  { %1734 = vmatprep.subr.bf16.mxu1 %v4404_v57  ;;  %v4483_v56 = vld [vmem:[%s6355_s1 + $0x6e0] ss:$20 sps:$4 sm:$0xff]   ;;  %v4491_v57 = vld [vmem:[%s6355_s1 + $0x6bc] ss:$20 sps:$4 sm:$0xff]  }
  0x37   :  { %1694 = vmatpush2.bf16.msra.mxu0 %v4403_v58  ;;  %v4498_v58 = vld [vmem:[%s6355_s1 + $0x1e8] ss:$20 sps:$4 sm:$0xff]  }
  0x38   :  { %1695 = vmatprep.subr.bf16.mxu0 %v4407_v59  ;;  %1735 = vmatpush2.bf16.msra.mxu1 %v4406_v60  ;;  %v4506_v59 = vld [vmem:[%s6355_s1 + $0x1c4] ss:$20 sps:$4 sm:$0xff]  }
  0x39   :  { %1736 = vmatprep.subr.bf16.mxu1 %v4410_v61  ;;  %v4489_v60 = vld [vmem:[%s6355_s1 + $0x6b8] ss:$20 sps:$4 sm:$0xff]   ;;  %v4497_v61 = vld [vmem:[%s6355_s1 + $0x694] ss:$20 sps:$4 sm:$0xff]  }
  0x3b   :  { %1696 = vmatpush2.bf16.msra.mxu0 %v4409_v62  ;;  %v4504_v62 = vld [vmem:[%s6355_s1 + $0x1c0] ss:$20 sps:$4 sm:$0xff]  }
  0x3c   :  { %1697 = vmatprep.subr.bf16.mxu0 %v4413_v63  ;;  %1737 = vmatpush2.bf16.msra.mxu1 %v4412_v0  ;;  %v4512_v63 = vld [vmem:[%s6355_s1 + $0x19c] ss:$20 sps:$4 sm:$0xff]  }
  0x3d   :  { %1738 = vmatprep.subr.bf16.mxu1 %v4416_v1  ;;  %v4495_v0 = vld [vmem:[%s6355_s1 + $0x690] ss:$20 sps:$4 sm:$0xff]   ;;  %v4503_v1 = vld [vmem:[%s6355_s1 + $0x66c] ss:$20 sps:$4 sm:$0xff]  }
  0x3f   :  { %1698 = vmatpush2.bf16.msra.mxu0 %v4415_v2  ;;  %v4510_v2 = vld [vmem:[%s6355_s1 + $0x198] ss:$20 sps:$4 sm:$0xff]  }
  0x40   :  { %1749 = vmatprep.subr.bf16.mxu0 %v4423_v3  ;;  %1739 = vmatpush2.bf16.msra.mxu1 %v4419_v4  ;;  %v4520_v3 = vld [vmem:[%s6355_s1 + $0x174] ss:$20 sps:$4 sm:$0xff]  }
  0x41   :  { %1831 = vmatprep.subr.bf16.mxu1 %v4434_v6  ;;  %v4501_v4 = vld [vmem:[%s6355_s1 + $0x668] ss:$20 sps:$4 sm:$0xff]   ;;  %v4509_v6 = vld [vmem:[%s6355_s1 + $0x644] ss:$20 sps:$4 sm:$0xff]  }
  0x42   :  { %1700 = vmatmul.mubr.bf16.vlgmr.msra.gmra.mxu0 %v5180_v5 }
  0x43   :  { %1750 = vmatpush1.bf16.msra.mxu0 %v4421_v7  ;;  %1741 = vmatmul.mubr.bf16.vlgmr.msra.gmra.mxu1 %v5188_v8  ;;  %v4518_v7 = vld [vmem:[%s6355_s1 + $0x170] ss:$20 sps:$4 sm:$0xff]  }
  0x44   :  { %1751 = vmatprep.subr.bf16.mxu0 %v4428_v9  ;;  %1832 = vmatpush1.bf16.msra.mxu1 %v4432_v10  ;;  %v4523_v9 = vld [vmem:[%s6355_s1 + $0x14c] ss:$20 sps:$4 sm:$0xff]  }
  0x45   :  { %1863 = vmatprep.mubr.bf16.mxu1 %v5117_v48  ;;  %1833 = vmatprep.subr.bf16.mxu1 %v4440_v11  ;;  %v4507_v10 = vld [vmem:[%s6355_s1 + $0x640] ss:$20 sps:$4 sm:$0xff]   ;;  %v4517_v11 = vld [vmem:[%s6355_s1 + $0x784] ss:$20 sps:$4 sm:$0xff]  }
  0x46   :  { %1781 = vmatprep.mubr.bf16.mxu0 %v5263_v31 }
  0x47   :  { %1752 = vmatpush1.bf16.msra.mxu0 %v4426_v12  ;;  %v4521_v12 = vld [vmem:[%s6355_s1 + $0x148] ss:$20 sps:$4 sm:$0xff]  }
  0x48   :  { %1753 = vmatprep.subr.bf16.mxu0 %v4431_v13  ;;  %1834 = vmatpush1.bf16.msra.mxu1 %v4438_v14  ;;  %v5391_v13 = vcombine.low %v5256_v29, %v5256_v29  ;;  %v4530_v14 = vld [vmem:[%s6355_s1 + $0x624] ss:$20 sps:$4 sm:$0xff]   ;;  %v4546_v29 = vld [vmem:[%s6355_s1 + $0x5a8] ss:$20 sps:$4 sm:$0xff]  }
  0x49   :  { %1835 = vmatprep.subr.bf16.mxu1 %v4446_v15  ;;  %v4515_v15 = vld [vmem:[%s6355_s1 + $0x780] ss:$20 sps:$4 sm:$0xff]  }
  0x4b   :  { %1754 = vmatpush1.bf16.msra.mxu0 %v4429_v16  ;;  %v4526_v16 = vld [vmem:[%s6355_s1 + $0x3a4] ss:$20 sps:$4 sm:$0xff]  }
  0x4c   :  { %1755 = vmatprep.subr.bf16.mxu0 %v4437_v17  ;;  %1836 = vmatpush1.bf16.msra.mxu1 %v4444_v18  ;;  %v4528_v17 = vld [vmem:[%s6355_s1 + $0x620] ss:$20 sps:$4 sm:$0xff]   ;;  %v4536_v18 = vld [vmem:[%s6355_s1 + $0x5fc] ss:$20 sps:$4 sm:$0xff]  }
  0x4d   :  { %1837 = vmatprep.subr.bf16.mxu1 %v4452_v19  ;;  %v4909_v19 = vmov 0  }
  0x4f   :  { %1756 = vmatpush1.bf16.msra.mxu0 %v4435_v20  ;;  %v5413_v20 = vld [vmem:[%s6354_s0 + $0x18] ss:$0 sps:$4 sm:$0xff]  }
  0x50   :  { %1757 = vmatprep.subr.bf16.mxu0 %v4443_v21  ;;  %1838 = vmatpush1.bf16.msra.mxu1 %v4450_v22  ;;  %v4534_v21 = vld [vmem:[%s6355_s1 + $0x5f8] ss:$20 sps:$4 sm:$0xff]   ;;  %v4542_v22 = vld [vmem:[%s6355_s1 + $0x5d4] ss:$20 sps:$4 sm:$0xff]  }
  0x51   :  { %1839 = vmatprep.subr.bf16.mxu1 %v4458_v23  ;;  %v4524_v23 = vld [vmem:[%s6355_s1 + $0x3a0] ss:$20 sps:$4 sm:$0xff]  }
  0x53   :  { %1758 = vmatpush1.bf16.msra.mxu0 %v4441_v24  ;;  %v4533_v24 = vld [vmem:[%s6355_s1 + $0x37c] ss:$20 sps:$4 sm:$0xff]  }
  0x54   :  { %1759 = vmatprep.subr.bf16.mxu0 %v4449_v25  ;;  %1840 = vmatpush1.bf16.msra.mxu1 %v4456_v26  ;;  %v4540_v25 = vld [vmem:[%s6355_s1 + $0x5d0] ss:$20 sps:$4 sm:$0xff]   ;;  %v4548_v26 = vld [vmem:[%s6355_s1 + $0x5ac] ss:$20 sps:$4 sm:$0xff]  }
  0x55   :  { %1841 = vmatprep.subr.bf16.mxu1 %v4464_v27  ;;  %v4531_v27 = vld [vmem:[%s6355_s1 + $0x378] ss:$20 sps:$4 sm:$0xff]  }
  0x57   :  { %1760 = vmatpush1.bf16.msra.mxu0 %v4447_v28  ;;  %v4539_v28 = vld [vmem:[%s6355_s1 + $0x354] ss:$20 sps:$4 sm:$0xff]  }
  0x58   :  { %1761 = vmatprep.subr.bf16.mxu0 %v4455_v30  ;;  %1842 = vmatpush1.bf16.msra.mxu1 %v4462_v32  ;;  %v4554_v30 = vld [vmem:[%s6355_s1 + $0x584] ss:$20 sps:$4 sm:$0xff]  }
  0x59   :  { %1843 = vmatprep.subr.bf16.mxu1 %v4470_v33  ;;  %v4537_v32 = vld [vmem:[%s6355_s1 + $0x350] ss:$20 sps:$4 sm:$0xff]   ;;  %v4545_v33 = vld [vmem:[%s6355_s1 + $0x32c] ss:$20 sps:$4 sm:$0xff]  }
  0x5b   :  { %1762 = vmatpush1.bf16.msra.mxu0 %v4453_v34  ;;  %v4552_v34 = vld [vmem:[%s6355_s1 + $0x580] ss:$20 sps:$4 sm:$0xff]  }
  0x5c   :  { %1763 = vmatprep.subr.bf16.mxu0 %v4461_v35  ;;  %1844 = vmatpush1.bf16.msra.mxu1 %v4468_v36  ;;  %v4560_v35 = vld [vmem:[%s6355_s1 + $0x55c] ss:$20 sps:$4 sm:$0xff]  }
  0x5d   :  { %1845 = vmatprep.subr.bf16.mxu1 %v4476_v37  ;;  %v4543_v36 = vld [vmem:[%s6355_s1 + $0x328] ss:$20 sps:$4 sm:$0xff]   ;;  %v4551_v37 = vld [vmem:[%s6355_s1 + $0x304] ss:$20 sps:$4 sm:$0xff]  }
  0x5f   :  { %1764 = vmatpush1.bf16.msra.mxu0 %v4459_v38  ;;  %v4558_v38 = vld [vmem:[%s6355_s1 + $0x558] ss:$20 sps:$4 sm:$0xff]  }
  0x60   :  { %1765 = vmatprep.subr.bf16.mxu0 %v4467_v39  ;;  %1846 = vmatpush1.bf16.msra.mxu1 %v4474_v40  ;;  %v4566_v39 = vld [vmem:[%s6355_s1 + $0x534] ss:$20 sps:$4 sm:$0xff]  }
  0x61   :  { %1847 = vmatprep.subr.bf16.mxu1 %v4482_v41  ;;  %v4549_v40 = vld [vmem:[%s6355_s1 + $0x300] ss:$20 sps:$4 sm:$0xff]   ;;  %v4557_v41 = vld [vmem:[%s6355_s1 + $0x2dc] ss:$20 sps:$4 sm:$0xff]  }
  0x63   :  { %1766 = vmatpush2.bf16.msra.mxu0 %v4465_v42  ;;  %v4564_v42 = vld [vmem:[%s6355_s1 + $0x530] ss:$20 sps:$4 sm:$0xff]  }
  0x64   :  { %1767 = vmatprep.subr.bf16.mxu0 %v4473_v43  ;;  %1848 = vmatpush2.bf16.msra.mxu1 %v4480_v44  ;;  %v4572_v43 = vld [vmem:[%s6355_s1 + $0x50c] ss:$20 sps:$4 sm:$0xff]  }
  0x65   :  { %1849 = vmatprep.subr.bf16.mxu1 %v4488_v45  ;;  %v4555_v44 = vld [vmem:[%s6355_s1 + $0x2d8] ss:$20 sps:$4 sm:$0xff]   ;;  %v4563_v45 = vld [vmem:[%s6355_s1 + $0x2b4] ss:$20 sps:$4 sm:$0xff]  }
  0x67   :  { %1768 = vmatpush2.bf16.msra.mxu0 %v4471_v46  ;;  %v4570_v46 = vld [vmem:[%s6355_s1 + $0x508] ss:$20 sps:$4 sm:$0xff]  }
  0x68   :  { %1769 = vmatprep.subr.bf16.mxu0 %v4479_v47  ;;  %1850 = vmatpush2.bf16.msra.mxu1 %v4486_v49  ;;  %v4578_v47 = vld [vmem:[%s6355_s1 + $0x764] ss:$20 sps:$4 sm:$0xff]  }
  0x69   :  { %1851 = vmatprep.subr.bf16.mxu1 %v4494_v50  ;;  %v4561_v49 = vld [vmem:[%s6355_s1 + $0x2b0] ss:$20 sps:$4 sm:$0xff]   ;;  %v4569_v50 = vld [vmem:[%s6355_s1 + $0x28c] ss:$20 sps:$4 sm:$0xff]  }
  0x6b   :  { %1770 = vmatpush2.bf16.msra.mxu0 %v4477_v51  ;;  %v4576_v51 = vld [vmem:[%s6355_s1 + $0x760] ss:$20 sps:$4 sm:$0xff]  }
  0x6c   :  { %1771 = vmatprep.subr.bf16.mxu0 %v4485_v53  ;;  %1852 = vmatpush2.bf16.msra.mxu1 %v4492_v54  ;;  %v4584_v53 = vld [vmem:[%s6355_s1 + $0x73c] ss:$20 sps:$4 sm:$0xff]  }
  0x6d   :  { %1853 = vmatprep.subr.bf16.mxu1 %v4500_v55  ;;  %v4567_v54 = vld [vmem:[%s6355_s1 + $0x288] ss:$20 sps:$4 sm:$0xff]   ;;  %v4575_v55 = vld [vmem:[%s6355_s1 + $0x4e4] ss:$20 sps:$4 sm:$0xff]  }
  0x6f   :  { %1772 = vmatpush2.bf16.msra.mxu0 %v4483_v56  ;;  %v4582_v56 = vld [vmem:[%s6355_s1 + $0x738] ss:$20 sps:$4 sm:$0xff]  }
  0x70   :  { %1773 = vmatprep.subr.bf16.mxu0 %v4491_v57  ;;  %1854 = vmatpush2.bf16.msra.mxu1 %v4498_v58  ;;  %v4590_v57 = vld [vmem:[%s6355_s1 + $0x714] ss:$20 sps:$4 sm:$0xff]  }
  0x71   :  { %1855 = vmatprep.subr.bf16.mxu1 %v4506_v59  ;;  %v4573_v58 = vld [vmem:[%s6355_s1 + $0x4e0] ss:$20 sps:$4 sm:$0xff]   ;;  %v4581_v59 = vld [vmem:[%s6355_s1 + $0x4bc] ss:$20 sps:$4 sm:$0xff]  }
  0x73   :  { %1774 = vmatpush2.bf16.msra.mxu0 %v4489_v60  ;;  %v4588_v60 = vld [vmem:[%s6355_s1 + $0x710] ss:$20 sps:$4 sm:$0xff]  }
  0x74   :  { %1775 = vmatprep.subr.bf16.mxu0 %v4497_v61  ;;  %1856 = vmatpush2.bf16.msra.mxu1 %v4504_v62  ;;  %v4596_v61 = vld [vmem:[%s6355_s1 + $0x6ec] ss:$20 sps:$4 sm:$0xff]  }
  0x75   :  { %1857 = vmatprep.subr.bf16.mxu1 %v4512_v63  ;;  %v4579_v62 = vld [vmem:[%s6355_s1 + $0x4b8] ss:$20 sps:$4 sm:$0xff]   ;;  %v4587_v63 = vld [vmem:[%s6355_s1 + $0x494] ss:$20 sps:$4 sm:$0xff]  }
  0x77   :  { %1776 = vmatpush2.bf16.msra.mxu0 %v4495_v0  ;;  %v4594_v0 = vld [vmem:[%s6355_s1 + $0x6e8] ss:$20 sps:$4 sm:$0xff]  }
  0x78   :  { %1777 = vmatprep.subr.bf16.mxu0 %v4503_v1  ;;  %1858 = vmatpush2.bf16.msra.mxu1 %v4510_v2  ;;  %v4602_v1 = vld [vmem:[%s6355_s1 + $0x6c4] ss:$20 sps:$4 sm:$0xff]  }
  0x79   :  { %1859 = vmatprep.subr.bf16.mxu1 %v4520_v3  ;;  %v4585_v2 = vld [vmem:[%s6355_s1 + $0x490] ss:$20 sps:$4 sm:$0xff]   ;;  %v4593_v3 = vld [vmem:[%s6355_s1 + $0x46c] ss:$20 sps:$4 sm:$0xff]  }
  0x7b   :  { %1778 = vmatpush2.bf16.msra.mxu0 %v4501_v4  ;;  %v4600_v4 = vld [vmem:[%s6355_s1 + $0x6c0] ss:$20 sps:$4 sm:$0xff]  }
  0x7c   :  { %1779 = vmatprep.subr.bf16.mxu0 %v4509_v6  ;;  %1860 = vmatpush2.bf16.msra.mxu1 %v4518_v7  ;;  %v4608_v6 = vld [vmem:[%s6355_s1 + $0x69c] ss:$20 sps:$4 sm:$0xff]  }
  0x7d   :  { %1861 = vmatprep.subr.bf16.mxu1 %v4523_v9  ;;  %v4591_v7 = vld [vmem:[%s6355_s1 + $0x468] ss:$20 sps:$4 sm:$0xff]   ;;  %v4599_v9 = vld [vmem:[%s6355_s1 + $0x444] ss:$20 sps:$4 sm:$0xff]  }
  0x7f   :  { %1780 = vmatpush2.bf16.msra.mxu0 %v4507_v10  ;;  %v4606_v10 = vld [vmem:[%s6355_s1 + $0x698] ss:$20 sps:$4 sm:$0xff]  }
  0x80   :  { %1804 = vmatprep.subr.bf16.mxu0 %v4517_v11  ;;  %1862 = vmatpush2.bf16.msra.mxu1 %v4521_v12  ;;  %v4614_v11 = vld [vmem:[%s6355_s1 + $0x674] ss:$20 sps:$4 sm:$0xff]  }
  0x81   :  { %1913 = vmatprep.subr.bf16.mxu1 %v4530_v14  ;;  %v4597_v12 = vld [vmem:[%s6355_s1 + $0x440] ss:$20 sps:$4 sm:$0xff]   ;;  %v4605_v14 = vld [vmem:[%s6355_s1 + $0x41c] ss:$20 sps:$4 sm:$0xff]  }
  0x82   :  { %1782 = vmatmul.mubr.bf16.vlgmr.msra.gmra.mxu0 %v5391_v13 }
  0x83   :  { %1805 = vmatpush1.bf16.msra.mxu0 %v4515_v15  ;;  %1822 = vmatprep.mubr.bf16.mxu0 %v4909_v19  ;;  %v4612_v15 = vld [vmem:[%s6355_s1 + $0x670] ss:$20 sps:$4 sm:$0xff]  }
  0x84   :  { %1872 = vmatprep.subr.bf16.mxu0 %v4526_v16  ;;  %1864 = vmatmul.mubr.bf16.vlgmr.msra.gmra.mxu1 %v5180_v5  ;;  %v4620_v16 = vld [vmem:[%s6355_s1 + $0x64c] ss:$20 sps:$4 sm:$0xff]  }
  0x85   :  { %1914 = vmatpush1.bf16.msra.mxu1 %v4528_v17  ;;  %1945 = vmatprep.mubr.bf16.mxu1 %v5263_v31  ;;  %v4603_v17 = vld [vmem:[%s6355_s1 + $0x418] ss:$20 sps:$4 sm:$0xff]  }
  0x86   :  { %1915 = vmatprep.subr.bf16.mxu1 %v4536_v18  ;;  %v4611_v18 = vld [vmem:[%s6355_s1 + $0x3f4] ss:$20 sps:$4 sm:$0xff]  }
  0x89   :  { %1916 = vmatpush1.bf16.msra.mxu1 %v4534_v21  ;;  %v4618_v21 = vld [vmem:[%s6355_s1 + $0x648] ss:$20 sps:$4 sm:$0xff]  }
  0x8a   :  { %3991 = vmatmul.mubr.msk.bf16.vlgmr.msra.gmra.mxu0 %vm1663_vm0, %v5413_v20  ;;  %1917 = vmatprep.subr.bf16.mxu1 %v4542_v22  ;;  %v4626_v22 = vld [vmem:[%s6355_s1 + $0x4e8] ss:$20 sps:$4 sm:$0xff]  }
  0x8b   :  { %1873 = vmatpush1.bf16.msra.mxu0 %v4524_v23  ;;  %1904 = vmatprep.mubr.bf16.mxu0 %v5129_v52  ;;  %v4609_v23 = vld [vmem:[%s6355_s1 + $0x3f0] ss:$20 sps:$4 sm:$0xff]  }
  0x8c   :  { %1874 = vmatprep.subr.bf16.mxu0 %v4533_v24  ;;  %v4617_v24 = vld [vmem:[%s6355_s1 + $0x3cc] ss:$20 sps:$4 sm:$0xff]  }
  0x8d   :  { %1918 = vmatpush1.bf16.msra.mxu1 %v4540_v25  ;;  %v4627_v25 = vld [vmem:[%s6355_s1 + $0x3a8] ss:$20 sps:$4 sm:$0xff]  }
  0x8e   :  { %1919 = vmatprep.subr.bf16.mxu1 %v4548_v26  ;;  %v4630_v26 = vld [vmem:[%s6355_s1 + $0x4c0] ss:$20 sps:$4 sm:$0xff]  }
  0x8f   :  { %1875 = vmatpush1.bf16.msra.mxu0 %v4531_v27  ;;  %v4615_v27 = vld [vmem:[%s6355_s1 + $0x3c8] ss:$20 sps:$4 sm:$0xff]  }
  0x90   :  { %1876 = vmatprep.subr.bf16.mxu0 %v4539_v28  ;;  %v4623_v28 = vld [vmem:[%s6355_s1 + $0x78c] ss:$20 sps:$4 sm:$0xff]  }
  0x91   :  { %1920 = vmatpush1.bf16.msra.mxu1 %v4546_v29  ;;  %v4621_v29 = vld [vmem:[%s6355_s1 + $0x788] ss:$20 sps:$4 sm:$0xff]  }
  0x92   :  { %1921 = vmatprep.subr.bf16.mxu1 %v4554_v30  ;;  %v4631_v30 = vld [vmem:[%s6355_s1 + $0x380] ss:$20 sps:$4 sm:$0xff]  }
  0x93   :  { %1877 = vmatpush1.bf16.msra.mxu0 %v4537_v32  ;;  %v4634_v32 = vld [vmem:[%s6355_s1 + $0x498] ss:$20 sps:$4 sm:$0xff]  }
  0x94   :  { %1878 = vmatprep.subr.bf16.mxu0 %v4545_v33  ;;  %v4624_v33 = vld [vmem:[%s6355_s1 + $0x268] ss:$20 sps:$4 sm:$0xff]  }
  0x95   :  { %1922 = vmatpush1.bf16.msra.mxu1 %v4552_v34  ;;  %v4635_v34 = vld [vmem:[%s6355_s1 + $0x358] ss:$20 sps:$4 sm:$0xff]  }
  0x96   :  { %1923 = vmatprep.subr.bf16.mxu1 %v4560_v35  ;;  %v4638_v35 = vld [vmem:[%s6355_s1 + $0x470] ss:$20 sps:$4 sm:$0xff]  }
  0x97   :  { %1879 = vmatpush1.bf16.msra.mxu0 %v4543_v36  ;;  %v4625_v36 = vld [vmem:[%s6355_s1 + $0x128] ss:$20 sps:$4 sm:$0xff]  }
  0x98   :  { %1880 = vmatprep.subr.bf16.mxu0 %v4551_v37  ;;  %v4642_v37 = vld [vmem:[%s6355_s1 + $0x448] ss:$20 sps:$4 sm:$0xff]  }
  0x99   :  { %1924 = vmatpush1.bf16.msra.mxu1 %v4558_v38  ;;  %v4628_v38 = vld [vmem:[%s6355_s1 + $0x240] ss:$20 sps:$4 sm:$0xff]  }
  0x9a   :  { %1925 = vmatprep.subr.bf16.mxu1 %v4566_v39  ;;  %v4643_v39 = vld [vmem:[%s6355_s1 + $0x308] ss:$20 sps:$4 sm:$0xff]  }
  0x9b   :  { %1881 = vmatpush1.bf16.msra.mxu0 %v4549_v40  ;;  %v4629_v40 = vld [vmem:[%s6355_s1 + $0x100] ss:$20 sps:$4 sm:$0xff]  }
  0x9c   :  { %1882 = vmatprep.subr.bf16.mxu0 %v4557_v41  ;;  %v4646_v41 = vld [vmem:[%s6355_s1 + $0x420] ss:$20 sps:$4 sm:$0xff]  }
  0x9d   :  { %1926 = vmatpush1.bf16.msra.mxu1 %v4564_v42  ;;  %v4632_v42 = vld [vmem:[%s6355_s1 + $0x218] ss:$20 sps:$4 sm:$0xff]  }
  0x9e   :  { %1927 = vmatprep.subr.bf16.mxu1 %v4572_v43  ;;  %v4647_v43 = vld [vmem:[%s6355_s1 + $0x2e0] ss:$20 sps:$4 sm:$0xff]  }
  0x9f   :  { %1883 = vmatpush1.bf16.msra.mxu0 %v4555_v44  ;;  %v4650_v44 = vld [vmem:[%s6355_s1 + $0x3f8] ss:$20 sps:$4 sm:$0xff]  }
  0xa0   :  { %1884 = vmatprep.subr.bf16.mxu0 %v4563_v45  ;;  %v4636_v45 = vld [vmem:[%s6355_s1 + $0x1f0] ss:$20 sps:$4 sm:$0xff]  }
  0xa1   :  { %1928 = vmatpush1.bf16.msra.mxu1 %v4570_v46  ;;  %v4651_v46 = vld [vmem:[%s6355_s1 + $0x2b8] ss:$20 sps:$4 sm:$0xff]  }
  0xa2   :  { %1929 = vmatprep.subr.bf16.mxu1 %v4578_v47  ;;  %v4654_v47 = vld [vmem:[%s6355_s1 + $0x3d0] ss:$20 sps:$4 sm:$0xff]  }
  0xa3   :  { %1885 = vmatpush1.bf16.msra.mxu0 %v4561_v49  ;;  %v4637_v49 = vld [vmem:[%s6355_s1 + $0xb0] ss:$20 sps:$4 sm:$0xff]  }
  0xa4   :  { %1886 = vmatprep.subr.bf16.mxu0 %v4569_v50  ;;  %v4640_v50 = vld [vmem:[%s6355_s1 + $0x1c8] ss:$20 sps:$4 sm:$0xff]  }
  0xa5   :  { %1930 = vmatpush2.bf16.msra.mxu1 %v4576_v51  ;;  %v4655_v51 = vld [vmem:[%s6355_s1 + $0x290] ss:$20 sps:$4 sm:$0xff]  }
  0xa6   :  { %1931 = vmatprep.subr.bf16.mxu1 %v4584_v53  ;;  %v4641_v53 = vld [vmem:[%s6355_s1 + $0x88] ss:$20 sps:$4 sm:$0xff]  }
  0xa7   :  { %1887 = vmatpush1.bf16.msra.mxu0 %v4567_v54  ;;  %v4644_v54 = vld [vmem:[%s6355_s1 + $0x1a0] ss:$20 sps:$4 sm:$0xff]  }
  0xa8   :  { %1888 = vmatprep.subr.bf16.mxu0 %v4575_v55  ;;  %v4672_v55 = vld [vmem:[%s6355_s1 + $0x790] ss:$20 sps:$4 sm:$0xff]  }
  0xa9   :  { %1932 = vmatpush2.bf16.msra.mxu1 %v4582_v56  ;;  %v4675_v56 = vld [vmem:[%s6357_s3 + $0xac] ss:$12 sps:$4 sm:$0xff]  }
  0xaa   :  { %1933 = vmatprep.subr.bf16.mxu1 %v4590_v57  ;;  %v4645_v57 = vld [vmem:[%s6355_s1 + $0x60] ss:$20 sps:$4 sm:$0xff]  }
  0xab   :  { %1889 = vmatpush2.bf16.msra.mxu0 %v4573_v58  ;;  %v4648_v58 = vld [vmem:[%s6355_s1 + $0x178] ss:$20 sps:$4 sm:$0xff]  }
  0xac   :  { %1890 = vmatprep.subr.bf16.mxu0 %v4581_v59  ;;  %v4910_v59 = vmov 0.0  }
  0xad   :  { %1934 = vmatpush2.bf16.msra.mxu1 %v4588_v60  ;;  %v4649_v60 = vld [vmem:[%s6355_s1 + $0x38] ss:$20 sps:$4 sm:$0xff]  }
  0xae   :  { %1935 = vmatprep.subr.bf16.mxu1 %v4596_v61  ;;  %v4652_v61 = vld [vmem:[%s6355_s1 + $0x150] ss:$20 sps:$4 sm:$0xff]  }
  0xaf   :  { %1891 = vmatpush2.bf16.msra.mxu0 %v4579_v62  ;;  %v4673_v62 = vld [vmem:[%s6357_s3 + $0xa8] ss:$12 sps:$4 sm:$0xff]  }
  0xb0   :  { %1892 = vmatprep.subr.bf16.mxu0 %v4587_v63  ;;  %v4653_v63 = vld [vmem:[%s6355_s1 + $0x10] ss:$20 sps:$4 sm:$0xff]  }
  0xb1   :  { %1936 = vmatpush2.bf16.msra.mxu1 %v4594_v0  ;;  %v4656_v0 = vld [vmem:[%s6355_s1 + $0x768] ss:$20 sps:$4 sm:$0xff]  }
  0xb2   :  { %1937 = vmatprep.subr.bf16.mxu1 %v4602_v1  ;;  %v4676_v1 = vld [vmem:[%s6357_s3 + $0x90] ss:$12 sps:$4 sm:$0xff]  }
  0xb3   :  { %1893 = vmatpush2.bf16.msra.mxu0 %v4585_v2  ;;  %v4681_v2 = vld [vmem:[%s6357_s3 + $0x7c] ss:$12 sps:$4 sm:$0xff]  }
  0xb4   :  { %1894 = vmatprep.subr.bf16.mxu0 %v4593_v3  ;;  %v4657_v3 = vld [vmem:[%s6355_s1 + $0x628] ss:$20 sps:$4 sm:$0xff]  }
  0xb5   :  { %1938 = vmatpush2.bf16.msra.mxu1 %v4600_v4  ;;  %v4658_v4 = vld [vmem:[%s6355_s1 + $0x740] ss:$20 sps:$4 sm:$0xff]  }
  0xb6   :  { %1939 = vmatprep.subr.bf16.mxu1 %v4608_v6  ;;  %v4679_v6 = vld [vmem:[%s6357_s3 + $0x78] ss:$12 sps:$4 sm:$0xff]  }
  0xb7   :  { %1895 = vmatpush2.bf16.msra.mxu0 %v4591_v7  ;;  %v4659_v7 = vld [vmem:[%s6355_s1 + $0x600] ss:$20 sps:$4 sm:$0xff]  }
  0xb8   :  { %1896 = vmatprep.subr.bf16.mxu0 %v4599_v9  ;;  %v4660_v9 = vld [vmem:[%s6355_s1 + $0x718] ss:$20 sps:$4 sm:$0xff]  }
  0xb9   :  { %1940 = vmatpush2.bf16.msra.mxu1 %v4606_v10  ;;  %v340_v10 = vlaneseq }
  0xba   :  { %1941 = vmatprep.subr.bf16.mxu1 %v4614_v11  ;;  %v4682_v11 = vld [vmem:[%s6357_s3 + $0x60] ss:$12 sps:$4 sm:$0xff]  }
  0xbb   :  { %1897 = vmatpush2.bf16.msra.mxu0 %v4597_v12  ;;  %v4687_v12 = vld [vmem:[%s6357_s3 + $0x4c] ss:$12 sps:$4 sm:$0xff]  }
  0xbc   :  { %1898 = vmatprep.subr.bf16.mxu0 %v4605_v14  ;;  %v4662_v14 = vld [vmem:[%s6355_s1 + $0x6f0] ss:$20 sps:$4 sm:$0xff]  }
  0xbd   :  { %1942 = vmatpush2.bf16.msra.mxu1 %v4612_v15  ;;  %v4685_v15 = vld [vmem:[%s6357_s3 + $0x48] ss:$12 sps:$4 sm:$0xff]  }
  0xbe   :  { %1943 = vmatprep.subr.bf16.mxu1 %v4620_v16  ;;  %v4690_v16 = vld [vmem:[%s6357_s3 + $0x34] ss:$12 sps:$4 sm:$0xff]  }
  0xbf   :  { %1899 = vmatpush2.bf16.msra.mxu0 %v4603_v17  ;;  %v4663_v17 = vld [vmem:[%s6355_s1 + $0x5b0] ss:$20 sps:$4 sm:$0xff]  }
  0xc0   :  { %1900 = vmatprep.subr.bf16.mxu0 %v4611_v18  ;;  %v4664_v18 = vld [vmem:[%s6355_s1 + $0x6c8] ss:$20 sps:$4 sm:$0xff]  }
  0xc1   :  { %1944 = vmatpush2.bf16.msra.mxu1 %v4618_v21  ;;  %v5785_v21 = vld [vmem:[%s6356_s2] sm:$0x1f] }
  0xc2   :  { %4186 = vmatprep.subr.bf16.mxu1 %v4626_v22 }
  0xc3   :  { %1901 = vmatpush2.bf16.msra.mxu0 %v4609_v23  ;;  %v4688_v23 = vld [vmem:[%s6357_s3 + $0x30] ss:$12 sps:$4 sm:$0xff]  }
  0xc4   :  { %1902 = vmatprep.subr.bf16.mxu0 %v4617_v24  ;;  %1946 = vmatmul.mubr.bf16.vlgmr.msra.gmra.mxu1 %v5391_v13  ;;  %v4693_v24 = vld [vmem:[%s6357_s3 + $0x1c] ss:$12 sps:$4 sm:$0xff]  }
  0xc5   :  { %4187 = vmatpush3.bf16.msra.mxu1 %v4627_v25  ;;  %2067 = vmatprep.mubr.bf16.mxu1 %v5129_v52  ;;  %v4639_v52 = vld [vmem:[%s6355_s1 + $0x330] ss:$20 sps:$4 sm:$0xff]   ;;  %v4665_v25 = vld [vmem:[%s6355_s1 + $0x588] ss:$20 sps:$4 sm:$0xff]  }
  0xc6   :  { %4188 = vmatprep.subr.bf16.mxu1 %v4630_v26 }
  0xc7   :  { %1903 = vmatpush2.bf16.msra.mxu0 %v4615_v27  ;;  %v4666_v27 = vld [vmem:[%s6355_s1 + $0x6a0] ss:$20 sps:$4 sm:$0xff]  }
  0xc8   :  { %1968 = vmatprep.subr.bf16.mxu0 %v4623_v28 }
  0xc9   :  { %4189 = vmatpush3.bf16.msra.mxu1 %v4631_v30  ;;  %v4696_v30 = vld [vmem:[%s6357_s3 + $0x4] ss:$12 sps:$4 sm:$0xff]  }
  0xca   :  { %1905 = vmatmul.mubr.bf16.vlgmr.msra.gmra.mxu0 %v5188_v8  ;;  %4190 = vmatprep.subr.bf16.mxu1 %v4634_v32 }
  0xcb   :  { %1969 = vmatpush1.bf16.msra.mxu0 %v4621_v29  ;;  %1986 = vmatprep.mubr.bf16.mxu0 %v4909_v19  ;;  %v4691_v29 = vld [vmem:[%s6357_s3 + $0x18] ss:$12 sps:$4 sm:$0xff]  }
  0xcc   :  { %4164 = vmatprep.subr.bf16.mxu0 %v4624_v33  ;;  %v4667_v33 = vld [vmem:[%s6355_s1 + $0x560] ss:$20 sps:$4 sm:$0xff]  }
  0xcd   :  { %4191 = vmatpush3.bf16.msra.mxu1 %v4635_v34 }
  0xce   :  { %4192 = vmatprep.subr.bf16.mxu1 %v4638_v35  ;;  %v4668_v35 = vld [vmem:[%s6355_s1 + $0x678] ss:$20 sps:$4 sm:$0xff]  }
  0xd1   :  { %4193 = vmatpush3.bf16.msra.mxu1 %v4639_v52 }
  0xd2   :  { %3992 = vmatmul.mubr.msk.bf16.vlgmr.msra.gmra.mxu0 %vm1663_vm0, %v5413_v20  ;;  %4194 = vmatprep.subr.bf16.mxu1 %v4642_v37 }
  0xd3   :  { %4165 = vmatpush3.bf16.msra.mxu0 %v4625_v36  ;;  %2027 = vmatprep.mubr.bf16.mxu0 %v5117_v48  ;;  %v4633_v48 = vld [vmem:[%s6355_s1 + $0xd8] ss:$20 sps:$4 sm:$0xff]  }
  0xd4   :  { %4166 = vmatprep.subr.bf16.mxu0 %v4628_v38  ;;  %v4694_v36 = vld [vmem:[%s6357_s3] ss:$12 sps:$4 sm:$0xff]  }
  0xd5   :  { %4195 = vmatpush3.bf16.msra.mxu1 %v4643_v39  ;;  %v4699_v39 = vld [vmem:[%s6357_s3 + $0x16c] ss:$12 sps:$4 sm:$0xff]  }
  0xd6   :  { %4196 = vmatprep.subr.bf16.mxu1 %v4646_v41 }
  0xd7   :  { %4167 = vmatpush3.bf16.msra.mxu0 %v4629_v40 }
  0xd8   :  { %4168 = vmatprep.subr.bf16.mxu0 %v4632_v42  ;;  %v4669_v42 = vld [vmem:[%s6355_s1 + $0x538] ss:$20 sps:$4 sm:$0xff]  }
  0xd9   :  { %4197 = vmatpush3.bf16.msra.mxu1 %v4647_v43 }
  0xda   :  { %4198 = vmatprep.subr.bf16.mxu1 %v4650_v44 }
  0xdb   :  { %4169 = vmatpush3.bf16.msra.mxu0 %v4633_v48  ;;  %v4670_v48 = vld [vmem:[%s6355_s1 + $0x650] ss:$20 sps:$4 sm:$0xff]  }
  0xdc   :  { %4170 = vmatprep.subr.bf16.mxu0 %v4636_v45 }
  0xdd   :  { %4199 = vmatpush3.bf16.msra.mxu1 %v4651_v46  ;;  %v4697_v46 = vld [vmem:[%s6357_s3 + $0x168] ss:$12 sps:$4 sm:$0xff]  }
  0xde   :  { %4200 = vmatprep.subr.bf16.mxu1 %v4654_v47 }
  0xdf   :  { %4171 = vmatpush3.bf16.msra.mxu0 %v4637_v49 }
  0xe0   :  { %4172 = vmatprep.subr.bf16.mxu0 %v4640_v50  ;;  %v4671_v50 = vld [vmem:[%s6355_s1 + $0x510] ss:$20 sps:$4 sm:$0xff]  }
  0xe1   :  { %4201 = vmatpush3.bf16.msra.mxu1 %v4655_v51 }
  0xe2   :  { %4287 = vmatprep.subr.bf16.mxu1 %v4910_v59 }
  0xe3   :  { %4173 = vmatpush3.bf16.msra.mxu0 %v4641_v53  ;;  %v4702_v53 = vld [vmem:[%s6357_s3 + $0x154] ss:$12 sps:$4 sm:$0xff]  }
  0xe4   :  { %4174 = vmatprep.subr.bf16.mxu0 %v4644_v54  ;;  %2068 = vmatmul.mubr.bf16.vlgmr.msra.gmra.mxu1 %v5188_v8  ;;  %v4678_v8 = vld [vmem:[%s6357_s3 + $0x94] ss:$12 sps:$4 sm:$0xff]   ;;  %v4700_v54 = vld [vmem:[%s6357_s3 + $0x150] ss:$12 sps:$4 sm:$0xff]  }
  0xe5   :  { %4288 = vmatpush3.bf16.msra.mxu1 %v4672_v55  ;;  %4289 = vmatprep.mubr.msk.bf16.mxu1 %vm4911_vm1, %v4910_v59  ;;  %v4723_v55 = vld [vmem:[%s6357_s3 + $0x22c] ss:$12 sps:$4 sm:$0xff]  }
  0xe6   :  { %2846 = vmatprep.subr.bf16.mxu1 %v4675_v56  ;;  %v4705_v56 = vld [vmem:[%s6357_s3 + $0x13c] ss:$12 sps:$4 sm:$0xff]  }
  0xe7   :  { %4175 = vmatpush3.bf16.msra.mxu0 %v4645_v57  ;;  %v4721_v57 = vld [vmem:[%s6357_s3 + $0x228] ss:$12 sps:$4 sm:$0xff]  }
  0xe8   :  { %4176 = vmatprep.subr.bf16.mxu0 %v4648_v58  ;;  %v4703_v58 = vld [vmem:[%s6357_s3 + $0x138] ss:$12 sps:$4 sm:$0xff]  }
  0xeb   :  { %4177 = vmatpush3.bf16.msra.mxu0 %v4649_v60  ;;  %v4726_v60 = vld [vmem:[%s6357_s3 + $0x214] ss:$12 sps:$4 sm:$0xff]  }
  0xec   :  { %4178 = vmatprep.subr.bf16.mxu0 %v4652_v61  ;;  %4290 = vmatmul.mubr.msk.bf16.vlgmr.msra.gmra.mxu1 %vm1663_vm0, %v5413_v20  ;;  %v4684_v20 = vld [vmem:[%s6357_s3 + $0x64] ss:$12 sps:$4 sm:$0xff]  }
  0xed   :  { %2847 = vmatpush1.bf16.msra.mxu1 %v4673_v62 }
  0xee   :  { %2848 = vmatprep.subr.bf16.mxu1 %v4678_v8 }
  0xef   :  { %4179 = vmatpush3.bf16.msra.mxu0 %v4653_v63 }
  0xf0   :  { %4208 = vmatprep.subr.bf16.mxu0 %v4656_v0 }
  0xf1   :  { %2849 = vmatpush1.bf16.msra.mxu1 %v4676_v1 }
  0xf2   :  { %2028 = vmatmul.mubr.bf16.vlgmr.msra.gmra.mxu0 %v5180_v5  ;;  %2850 = vmatprep.subr.bf16.mxu1 %v4681_v2  ;;  %v4661_v5 = vld [vmem:[%s6355_s1 + $0x5d8] ss:$20 sps:$4 sm:$0xff]  }
  0xf3   :  { %4209 = vmatpush3.bf16.msra.mxu0 %v4657_v3  ;;  %2107 = vmatprep.mubr.bf16.mxu0 %v5263_v31  ;;  %v5768_v31 = vshrl.u32 %v340_v10, 7 }
  0xf4   :  { %4210 = vmatprep.subr.bf16.mxu0 %v4658_v4 }
  0xf5   :  { %2851 = vmatpush1.bf16.msra.mxu1 %v4679_v6  ;;  %v5788_v22 = vsub.s32 0, %v5768_v31  ;;  %v5800_v26 = vsub.s32 1, %v5768_v31 }
  0xf6   :  { %2852 = vmatprep.subr.bf16.mxu1 %v4684_v20 }
  0xf7   :  { %4211 = vmatpush3.bf16.msra.mxu0 %v4659_v7  ;;  %v343_v28 = vrot.slane %v5785_v21, %v5788_v22  ;;  %v347_v32 = vrot.slane %v5785_v21, %v5800_v26 }
  0xf8   :  { %4212 = vmatprep.subr.bf16.mxu0 %v4660_v9 }
  0xf9   :  { %2853 = vmatpush1.bf16.msra.mxu1 %v4682_v11 }
  0xfa   :  { %2854 = vmatprep.subr.bf16.mxu1 %v4687_v12 }
  0xfb   :  { %4213 = vmatpush3.bf16.msra.mxu0 %v4661_v5 }
  0xfc   :  { %4214 = vmatprep.subr.bf16.mxu0 %v4662_v14 }
  0xfd   :  { %2855 = vmatpush1.bf16.msra.mxu1 %v4685_v15 }
  0xfe   :  { %2856 = vmatprep.subr.bf16.mxu1 %v4690_v16 }
  0xff   :  { %4215 = vmatpush3.bf16.msra.mxu0 %v4663_v17 }
 0x100   :  { %4216 = vmatprep.subr.bf16.mxu0 %v4664_v18 }
 0x101   :  { %2857 = vmatpush1.bf16.msra.mxu1 %v4688_v23 }
 0x102   :  { %v1701_v34 = vpop.f32.mrf.mxu0  ;;  %2858 = vmatprep.subr.bf16.mxu1 %v4693_v24 }
 0x103   :  { %4217 = vmatpush3.bf16.msra.mxu0 %v4665_v25  ;;  %v1702_v52 = vadd.f32 %v1701_v34, %v343_v28  ;;  %v1742_v38 = vpop.f32.mrf.mxu1 }
 0x104   :  { %v1703_v37 = vpop.f32.mrf.mxu0  ;;  %4218 = vmatprep.subr.bf16.mxu0 %v4666_v27 }
 0x105   :  { %v1704_v40 = vadd.f32 %v1703_v37, %v347_v32  ;;  %v5827_v41 = vadd.f32 %v1742_v38, %v1702_v52  ;;  %2859 = vmatpush1.bf16.msra.mxu1 %v4691_v29  ;;  %v1744_v44 = vpop.f32.mrf.mxu1 }
 0x106   :  { %v1705_v43 = vpop.f32.mrf.mxu0  ;;  %2860 = vmatprep.subr.bf16.mxu1 %v4696_v30 }
 0x107   :  { %4219 = vmatpush3.bf16.msra.mxu0 %v4667_v33  ;;  %v5835_v45 = vadd.f32 %v1744_v44, %v1704_v40  ;;  %v1746_v49 = vpop.f32.mrf.mxu1 }
 0x108   :  { %v1706_v47 = vpop.f32.mrf.mxu0  ;;  %4220 = vmatprep.subr.bf16.mxu0 %v4668_v35 }
 0x109   :  { %2861 = vmatpush1.bf16.msra.mxu1 %v4694_v36  ;;  %v1747_v51 = vpop.f32.mrf.mxu1 }
 0x10a   :  { %2862 = vmatprep.subr.bf16.mxu1 %v4699_v39 }
 0x10b   :  { %4221 = vmatpush3.bf16.msra.mxu0 %v4669_v42 }
 0x10c   :  { %4222 = vmatprep.subr.bf16.mxu0 %v4670_v48 }
 0x10d   :  { %2863 = vmatpush2.bf16.msra.mxu1 %v4697_v46 }
 0x10e   :  { %2864 = vmatprep.subr.bf16.mxu1 %v4702_v53 }
 0x10f   :  { %4223 = vmatpush3.bf16.msra.mxu0 %v4671_v50 }
 0x110   :  { %2887 = vmatprep.subr.bf16.mxu0 %v4723_v55 }
 0x111   :  { %2865 = vmatpush2.bf16.msra.mxu1 %v4700_v54 }
 0x112   :  { %16 = vsyncpa [#allocation3], 0  ;;  %2108 = vmatmul.mubr.bf16.vlgmr.msra.gmra.mxu0 %v5391_v13  ;;  %2866 = vmatprep.subr.bf16.mxu1 %v4705_v56  ;;  %v4708_v61 = vld [vmem:[%s6357_s3 + $0x124] ss:$12 sps:$4 sm:$0xff]   ;;  %v4729_v8 = vld [vmem:[%s6357_s3 + $0x1fc] ss:$12 sps:$4 sm:$0xff]  }
 0x113   :  { %2888 = vmatpush1.bf16.msra.mxu0 %v4721_v57  ;;  %v4724_v62 = vld [vmem:[%s6357_s3 + $0x210] ss:$12 sps:$4 sm:$0xff]   ;;  %v4706_v13 = vld [vmem:[%s6357_s3 + $0x120] ss:$12 sps:$4 sm:$0xff]   ;;  %v4727_v0 = vld [vmem:[%s6357_s3 + $0x1f8] ss:$12 sps:$4 sm:$0xff]  }
 0x114   :  { %2889 = vmatprep.subr.bf16.mxu0 %v4726_v60  ;;  %v4711_v63 = vld [vmem:[%s6357_s3 + $0x10c] ss:$12 sps:$4 sm:$0xff]   ;;  %v4732_v1 = vld [vmem:[%s6357_s3 + $0x1e4] ss:$12 sps:$4 sm:$0xff]   ;;  %v4709_v2 = vld [vmem:[%s6357_s3 + $0x108] ss:$12 sps:$4 sm:$0xff]  }
 0x115   :  { %2867 = vmatpush2.bf16.msra.mxu1 %v4703_v58  ;;  %v4714_v3 = vld [vmem:[%s6357_s3 + $0xf4] ss:$12 sps:$4 sm:$0xff]   ;;  %v4735_v6 = vld [vmem:[%s6357_s3 + $0x1cc] ss:$12 sps:$4 sm:$0xff]   ;;  %v4712_v20 = vld [vmem:[%s6357_s3 + $0xf0] ss:$12 sps:$4 sm:$0xff]  }
 0x116   :  { %2868 = vmatprep.subr.bf16.mxu1 %v4708_v61  ;;  %v4730_v4 = vld [vmem:[%s6357_s3 + $0x1e0] ss:$12 sps:$4 sm:$0xff]   ;;  %v4717_v7 = vld [vmem:[%s6357_s3 + $0xdc] ss:$12 sps:$4 sm:$0xff]   ;;  %v4715_v11 = vld [vmem:[%s6357_s3 + $0xd8] ss:$12 sps:$4 sm:$0xff]  }
 0x117   :  { %2890 = vmatpush1.bf16.msra.mxu0 %v4724_v62  ;;  %v4733_v9 = vld [vmem:[%s6357_s3 + $0x1c8] ss:$12 sps:$4 sm:$0xff]   ;;  %v4720_v12 = vld [vmem:[%s6357_s3 + $0xc4] ss:$12 sps:$4 sm:$0xff]   ;;  %v4718_v15 = vld [vmem:[%s6357_s3 + $0xc0] ss:$12 sps:$4 sm:$0xff]  }
 0x118   :  { %2891 = vmatprep.subr.bf16.mxu0 %v4729_v8  ;;  %v4738_v10 = vld [vmem:[%s6357_s3 + $0x1b4] ss:$12 sps:$4 sm:$0xff]   ;;  %v4736_v5 = vld [vmem:[%s6357_s3 + $0x1b0] ss:$12 sps:$4 sm:$0xff]   ;;  %v4739_v16 = vld [vmem:[%s6357_s3 + $0x198] ss:$12 sps:$4 sm:$0xff]  }
 0x119   :  { %2869 = vmatpush2.bf16.msra.mxu1 %v4706_v13  ;;  %v4741_v14 = vld [vmem:[%s6357_s3 + $0x19c] ss:$12 sps:$4 sm:$0xff]   ;;  %v4744_v17 = vld [vmem:[%s6357_s3 + $0x184] ss:$12 sps:$4 sm:$0xff]   ;;  %v4742_v18 = vld [vmem:[%s6357_s3 + $0x180] ss:$12 sps:$4 sm:$0xff]  }
 0x11a   :  { %2870 = vmatprep.subr.bf16.mxu1 %v4711_v63  ;;  %v4747_v23 = vld [vmem:[%s6357_s3 + $0x2ec] ss:$12 sps:$4 sm:$0xff]   ;;  %v4745_v24 = vld [vmem:[%s6357_s3 + $0x2e8] ss:$12 sps:$4 sm:$0xff]   ;;  %v4748_v27 = vld [vmem:[%s6357_s3 + $0x2d0] ss:$12 sps:$4 sm:$0xff]  }
 0x11b   :  { %2892 = vmatpush1.bf16.msra.mxu0 %v4727_v0  ;;  %v4750_v25 = vld [vmem:[%s6357_s3 + $0x2d4] ss:$12 sps:$4 sm:$0xff]   ;;  %v4753_v28 = vld [vmem:[%s6357_s3 + $0x2bc] ss:$12 sps:$4 sm:$0xff]   ;;  %v4751_v29 = vld [vmem:[%s6357_s3 + $0x2b8] ss:$12 sps:$4 sm:$0xff]  }
 0x11c   :  { %2893 = vmatprep.subr.bf16.mxu0 %v4732_v1  ;;  %v4756_v30 = vld [vmem:[%s6357_s3 + $0x2a4] ss:$12 sps:$4 sm:$0xff]   ;;  %v4754_v32 = vld [vmem:[%s6357_s3 + $0x2a0] ss:$12 sps:$4 sm:$0xff]   ;;  %v4757_v34 = vld [vmem:[%s6357_s3 + $0x288] ss:$12 sps:$4 sm:$0xff]  }
 0x11d   :  { %2871 = vmatpush2.bf16.msra.mxu1 %v4709_v2  ;;  %v4759_v33 = vld [vmem:[%s6357_s3 + $0x28c] ss:$12 sps:$4 sm:$0xff]   ;;  %v4762_v35 = vld [vmem:[%s6357_s3 + $0x274] ss:$12 sps:$4 sm:$0xff]   ;;  %v4760_v36 = vld [vmem:[%s6357_s3 + $0x270] ss:$12 sps:$4 sm:$0xff]  }
 0x11e   :  { %2872 = vmatprep.subr.bf16.mxu1 %v4714_v3  ;;  %v4765_v39 = vld [vmem:[%s6357_s3 + $0x25c] ss:$12 sps:$4 sm:$0xff]   ;;  %v4763_v43 = vld [vmem:[%s6357_s3 + $0x258] ss:$12 sps:$4 sm:$0xff]   ;;  %v4766_v54 = vld [vmem:[%s6357_s3 + $0x240] ss:$12 sps:$4 sm:$0xff]  }
 0x11f   :  { %2894 = vmatpush1.bf16.msra.mxu0 %v4730_v4  ;;  %v4768_v46 = vld [vmem:[%s6357_s3 + $0x244] ss:$12 sps:$4 sm:$0xff]   ;;  %vm2836_vm2 = vcmask 1043456   ;;  %v350_v2 = vsub.s32 2, %v5768_v31  ;;  %v354_v4 = vsub.s32 3, %v5768_v31  ;;  %vm2832_vm3 = vcmask 64512  }
 0x120   :  { %2895 = vmatprep.subr.bf16.mxu0 %v4735_v6  ;;  %v4769_v56 = vld [vmem:[%s6357_s3 + $0x2f0] ss:$12 sps:$4 sm:$0xff]   ;;  %v2293_v8 = vld [vmem:[%s6357_s3 + $0x300] sm:$0xff]  ;;  %vm3347_vm4 = vcmask 523264   ;;  %vm3564_vm5 = vcmask 916480   ;;  %vm3677_vm6 = vcmask 982016  }
 0x121   :  { %2873 = vmatpush2.bf16.msra.mxu1 %v4712_v20  ;;  %v4091_v13 = vcombine.high %v2293_v8, %v2293_v8  ;;  %v4090_v63 = vcombine.low %v2293_v8, %v2293_v8  ;;  %v4787_v1 = vld [vmem:[%s6357_s3 + $0x170] ss:$12 sps:$4 sm:$0xff]   ;;  %v351_v20 = vrot.slane %v5785_v21, %v350_v2 }
 0x122   :  { %2874 = vmatprep.subr.bf16.mxu1 %v4717_v7 }
 0x123   :  { %2896 = vmatpush1.bf16.msra.mxu0 %v4733_v9  ;;  %v2838_v0 = vsel %vm2836_vm2, %v4090_v63, 0  ;;  %v355_v9 = vrot.slane %v5785_v21, %v354_v4 }
 0x124   :  { %2897 = vmatprep.subr.bf16.mxu0 %v4738_v10 }
 0x125   :  { %2875 = vmatpush2.bf16.msra.mxu1 %v4715_v11 }
 0x126   :  { %2876 = vmatprep.subr.bf16.mxu1 %v4720_v12 }
 0x127   :  { %2898 = vmatpush1.bf16.msra.mxu0 %v4736_v5 }
 0x128   :  { %2899 = vmatprep.subr.bf16.mxu0 %v4741_v14 }
 0x129   :  { %2877 = vmatpush2.bf16.msra.mxu1 %v4718_v15 }
 0x12a   :  { %4093 = vmatprep.subr.msk.bf16.mxu1 %vm2836_vm2, %v4091_v13  ;;  %v4784_v13 = vld [vmem:[%s6357_s3 + $0x188] ss:$12 sps:$4 sm:$0xff]  }
 0x12b   :  { %2900 = vmatpush1.bf16.msra.mxu0 %v4739_v16 }
 0x12c   :  { %2901 = vmatprep.subr.bf16.mxu0 %v4744_v17 }
 0x12f   :  { %2902 = vmatpush1.bf16.msra.mxu0 %v4742_v18 }
 0x130   :  { %2903 = vmatprep.subr.bf16.mxu0 %v4747_v23 }
 0x133   :  { %2904 = vmatpush2.bf16.msra.mxu0 %v4745_v24 }
 0x134   :  { %2905 = vmatprep.subr.bf16.mxu0 %v4750_v25 }
 0x137   :  { %2906 = vmatpush2.bf16.msra.mxu0 %v4748_v27 }
 0x138   :  { %2907 = vmatprep.subr.bf16.mxu0 %v4753_v28 }
 0x13b   :  { %2908 = vmatpush2.bf16.msra.mxu0 %v4751_v29 }
 0x13c   :  { %2909 = vmatprep.subr.bf16.mxu0 %v4756_v30 }
 0x13f   :  { %2910 = vmatpush2.bf16.msra.mxu0 %v4754_v32 }
 0x140   :  { %2911 = vmatprep.subr.bf16.mxu0 %v4759_v33 }
 0x142   :  { %v1783_v52 = vpop.f32.mrf.mxu0 }
 0x143   :  { %2912 = vmatpush2.bf16.msra.mxu0 %v4757_v34  ;;  %v1784_v47 = vadd.f32 %v1783_v52, %v5827_v41  ;;  %v4770_v52 = vld [vmem:[%s6357_s3 + $0x230] ss:$12 sps:$4 sm:$0xff]  }
 0x144   :  { %v1785_v37 = vpop.f32.mrf.mxu0  ;;  %v1865_v38 = vpop.f32.mrf.mxu1  ;;  %2913 = vmatprep.subr.bf16.mxu0 %v4762_v35 }
 0x145   :  { %v1786_v51 = vadd.f32 %v1785_v37, %v5835_v45  ;;  %v1866_v12 = vadd.f32 %v1865_v38, %v351_v20  ;;  %v4771_v37 = vld [vmem:[%s6357_s3 + $0x2d8] ss:$12 sps:$4 sm:$0xff]  }
 0x146   :  { %v1787_v40 = vpop.f32.mrf.mxu0  ;;  %v1867_v42 = vpop.f32.mrf.mxu1  ;;  %v4772_v38 = vld [vmem:[%s6357_s3 + $0x218] ss:$12 sps:$4 sm:$0xff]  }
 0x147   :  { %2914 = vmatpush2.bf16.msra.mxu0 %v4760_v36  ;;  %v1868_v14 = vadd.f32 %v1867_v42, %v355_v9  ;;  %v4774_v40 = vld [vmem:[%s6357_s3 + $0x200] ss:$12 sps:$4 sm:$0xff]   ;;  %v4775_v42 = vld [vmem:[%s6357_s3 + $0x2a8] ss:$12 sps:$4 sm:$0xff]  }
 0x148   :  { %v1788_v44 = vpop.f32.mrf.mxu0  ;;  %v1869_v48 = vpop.f32.mrf.mxu1  ;;  %2915 = vmatprep.subr.bf16.mxu0 %v4765_v39  ;;  %v4773_v39 = vld [vmem:[%s6357_s3 + $0x2c0] ss:$12 sps:$4 sm:$0xff]  }
 0x149   :  { %v4776_v44 = vld [vmem:[%s6357_s3 + $0x1e8] ss:$12 sps:$4 sm:$0xff]   ;;  %v4777_v48 = vld [vmem:[%s6357_s3 + $0x290] ss:$12 sps:$4 sm:$0xff]  }
 0x14a   :  { %v1824_v49 = vpop.f32.mrf.mxu0  ;;  %v1870_v50 = vpop.f32.mrf.mxu1 }
 0x14b   :  { %v1825_v53 = vadd.f32 %v1824_v49, %v1784_v47  ;;  %2916 = vmatpush2.bf16.msra.mxu0 %v4763_v43  ;;  %v4778_v49 = vld [vmem:[%s6357_s3 + $0x1d0] ss:$12 sps:$4 sm:$0xff]   ;;  %v4779_v50 = vld [vmem:[%s6357_s3 + $0x278] ss:$12 sps:$4 sm:$0xff]  }
 0x14c   :  { %v1826_v55 = vpop.f32.mrf.mxu0  ;;  %2917 = vmatprep.subr.bf16.mxu0 %v4768_v46 }
 0x14d   :  { %v1827_v57 = vadd.f32 %v1826_v55, %v1786_v51  ;;  %v2155_v58 = vmax.f32 %v1825_v53, 0.0  ;;  %v4781_v55 = vld [vmem:[%s6357_s3 + $0x260] ss:$12 sps:$4 sm:$0xff]  }
 0x14e   :  { %v1828_v60 = vpop.f32.mrf.mxu0 }
 0x14f   :  { %v2156_v41 = vmax.f32 %v1827_v57, 0.0  ;;  %2918 = vmatpush2.bf16.msra.mxu0 %v4766_v54  ;;  %v5989_v62 = vpack.c.bf16 %v2155_v58, %v2155_v58  ;;  %v4780_v54 = vld [vmem:[%s6357_s3 + $0x1b8] ss:$12 sps:$4 sm:$0xff]   ;;  %v4782_v58 = vld [vmem:[%s6357_s3 + $0x1a0] ss:$12 sps:$4 sm:$0xff]  }
 0x150   :  { %v1829_v61 = vpop.f32.mrf.mxu0  ;;  %4254 = vmatprep.subr.bf16.mxu0 %v4769_v56 }
 0x151   :  { %v5987_v45 = vpack.c.bf16 %v2156_v41, %v2156_v41  ;;  %v4783_v41 = vld [vmem:[%s6357_s3 + $0x248] ss:$12 sps:$4 sm:$0xff]  }
 0x153   :  { %2878 = vmatprep.mubr.bf16.mxu1 %v5987_v45 }
 0x154   :  { %2879 = vmatmul.mubr.bf16.vlgmr.msra.gmra.mxu1 %v5989_v62 }
 0x155   :  { %2960 = vmatprep.mubr.bf16.mxu1 %v4909_v19  ;;  %2943 = vmatpush1.bf16.msra.mxu1 %v2838_v0 }
 0x156   :  { %4232 = vmatprep.subr.bf16.mxu1 %v4787_v1  ;;  %v358_v1 = vsub.s32 4, %v5768_v31  ;;  %v4865_v31 = vld [vmem:[%s6361_s7 + $0x30] sm:$0xff]  }
 0x184   :  { %v1947_v3 = vpop.f32.mrf.mxu1 }
 0x186   :  { %v1949_v6 = vpop.f32.mrf.mxu1 }
 0x188   :  { %v1951_v7 = vpop.f32.mrf.mxu1 }
 0x18a   :  { %v1906_v10 = vpop.f32.mrf.mxu0  ;;  %v1952_v11 = vpop.f32.mrf.mxu1 }
 0x18b   :  { %v1907_v15 = vadd.f32 %v1906_v10, %v1866_v12 }
 0x18c   :  { %v1908_v5 = vpop.f32.mrf.mxu0 }
 0x18d   :  { %v1909_v17 = vadd.f32 %v1908_v5, %v1868_v14  ;;  %v1948_v23 = vadd.f32 %v1947_v3, %v1907_v15  ;;  %v359_v3 = vrot.slane %v5785_v21, %v358_v1  ;;  %v4789_v21 = vld [vmem:[%s6357_s3 + $0x158] ss:$12 sps:$4 sm:$0xff]   ;;  %v4854_v1 = vld [vmem:[%s6359_s5 + $0x134] ss:$8 sps:$4 sm:$0xff]  }
 0x18e   :  { %v1910_v16 = vpop.f32.mrf.mxu0 }
 0x18f   :  { %v1950_v25 = vadd.f32 %v1949_v6, %v1909_v17  ;;  %v4788_v17 = vld [vmem:[%s6357_s3 + $0xb0] ss:$12 sps:$4 sm:$0xff]  }
 0x190   :  { %v1911_v18 = vpop.f32.mrf.mxu0 }
 0x192   :  { %v1988_v24 = vpop.f32.mrf.mxu0 }
 0x193   :  { %v1989_v27 = vadd.f32 %v1988_v24, %v1948_v23  ;;  %v4790_v23 = vld [vmem:[%s6357_s3 + $0x98] ss:$12 sps:$4 sm:$0xff]   ;;  %v4791_v24 = vld [vmem:[%s6357_s3 + $0x140] ss:$12 sps:$4 sm:$0xff]  }
 0x194   :  { %v1990_v28 = vpop.f32.mrf.mxu0 }
 0x195   :  { %v1991_v29 = vadd.f32 %v1990_v28, %v1950_v25  ;;  %v2157_v30 = vmax.f32 %v1989_v27, 0.0  ;;  %v4792_v25 = vld [vmem:[%s6357_s3 + $0x80] ss:$12 sps:$4 sm:$0xff]   ;;  %v4793_v27 = vld [vmem:[%s6357_s3 + $0x128] ss:$12 sps:$4 sm:$0xff]  }
 0x196   :  { %v1992_v32 = vpop.f32.mrf.mxu0  ;;  %v4795_v28 = vld [vmem:[%s6357_s3 + $0x110] ss:$12 sps:$4 sm:$0xff]  }
 0x197   :  { %v2158_v33 = vmax.f32 %v1991_v29, 0.0  ;;  %v2162_v36 = vpack.c.bf16 %v2157_v30, %v2157_v30  ;;  %v4796_v29 = vld [vmem:[%s6357_s3 + $0x50] ss:$12 sps:$4 sm:$0xff]   ;;  %v4797_v30 = vld [vmem:[%s6357_s3 + $0xf8] ss:$12 sps:$4 sm:$0xff]  }
 0x198   :  { %v1993_v34 = vpop.f32.mrf.mxu0  ;;  %v4798_v32 = vld [vmem:[%s6357_s3 + $0x38] ss:$12 sps:$4 sm:$0xff]  }
 0x199   :  { %v2163_v35 = vpack.c.bf16 %v2158_v33, %v2158_v33  ;;  %v4799_v33 = vld [vmem:[%s6357_s3 + $0xe0] ss:$12 sps:$4 sm:$0xff]  }
 0x19a   :  { %v4800_v34 = vld [vmem:[%s6357_s3 + $0x20] ss:$12 sps:$4 sm:$0xff]  }
 0x19b   :  { %2919 = vmatprep.mubr.bf16.mxu0 %v2163_v35 }
 0x19c   :  { %2920 = vmatmul.mubr.bf16.vlgmr.msra.gmra.mxu0 %v2162_v36 }
 0x19d   :  { %4255 = vmatpush3.bf16.msra.mxu0 %v4770_v52  ;;  %3041 = vmatprep.mubr.bf16.mxu0 %v2163_v35  ;;  %v4801_v35 = vld [vmem:[%s6357_s3 + $0xc8] ss:$12 sps:$4 sm:$0xff]  }
 0x19e   :  { %4256 = vmatprep.subr.bf16.mxu0 %v4771_v37  ;;  %v4802_v52 = vld [vmem:[%s6357_s3 + $0x8] ss:$12 sps:$4 sm:$0xff]  }
 0x1a1   :  { %4257 = vmatpush3.bf16.msra.mxu0 %v4772_v38  ;;  %v4806_v38 = vld [vmem:[%s6359_s5 + $0x74] ss:$8 sps:$4 sm:$0xff]  }
 0x1a2   :  { %4258 = vmatprep.subr.bf16.mxu0 %v4773_v39  ;;  %v4804_v39 = vld [vmem:[%s6359_s5 + $0x70] ss:$8 sps:$4 sm:$0xff]  }
 0x1a4   :  { %v4202_v43 = vpop.f32.mrf.mxu1 }
 0x1a5   :  { %4259 = vmatpush3.bf16.msra.mxu0 %v4774_v40  ;;  %v4809_v40 = vld [vmem:[%s6359_s5 + $0x64] ss:$8 sps:$4 sm:$0xff]  }
 0x1a6   :  { %4260 = vmatprep.subr.bf16.mxu0 %v4775_v42  ;;  %v4203_v46 = vpop.f32.mrf.mxu1  ;;  %v4812_v42 = vld [vmem:[%s6359_s5 + $0x54] ss:$8 sps:$4 sm:$0xff]  }
 0x1a7   :  { %v4204_v20 = vadd.f32 %v4203_v46, %v4202_v43  ;;  %v4810_v43 = vld [vmem:[%s6359_s5 + $0x50] ss:$8 sps:$4 sm:$0xff]   ;;  %v4818_v46 = vld [vmem:[%s6359_s5 + $0x34] ss:$8 sps:$4 sm:$0xff]  }
 0x1a8   :  { %v4205_v47 = vpop.f32.mrf.mxu1 }
 0x1a9   :  { %4261 = vmatpush3.bf16.msra.mxu0 %v4776_v44  ;;  %v4815_v44 = vld [vmem:[%s6359_s5 + $0x44] ss:$8 sps:$4 sm:$0xff]  }
 0x1aa   :  { %4262 = vmatprep.subr.bf16.mxu0 %v4777_v48  ;;  %v4206_v51 = vpop.f32.mrf.mxu1  ;;  %v4813_v48 = vld [vmem:[%s6359_s5 + $0x40] ss:$8 sps:$4 sm:$0xff]  }
 0x1ac   :  { %v2149_v53 = vpop.f32.mrf.mxu1 }
 0x1ad   :  { %4263 = vmatpush3.bf16.msra.mxu0 %v4778_v49  ;;  %v4816_v49 = vld [vmem:[%s6359_s5 + $0x30] ss:$8 sps:$4 sm:$0xff]  }
 0x1ae   :  { %4264 = vmatprep.subr.bf16.mxu0 %v4779_v50  ;;  %v4291_v56 = vpop.f32.mrf.mxu1  ;;  %v4821_v50 = vld [vmem:[%s6359_s5 + $0x24] ss:$8 sps:$4 sm:$0xff]  }
 0x1b0   :  { %v2152_v57 = vpop.f32.mrf.mxu1 }
 0x1b1   :  { %4265 = vmatpush3.bf16.msra.mxu0 %v4780_v54  ;;  %v4819_v54 = vld [vmem:[%s6359_s5 + $0x20] ss:$8 sps:$4 sm:$0xff]   ;;  %v4822_v57 = vld [vmem:[%s6359_s5 + $0x10] ss:$8 sps:$4 sm:$0xff]  }
 0x1b2   :  { %v4180_v60 = vpop.f32.mrf.mxu0  ;;  %4266 = vmatprep.subr.bf16.mxu0 %v4781_v55  ;;  %v4292_v61 = vpop.f32.mrf.mxu1  ;;  %v4824_v55 = vld [vmem:[%s6359_s5 + $0x14] ss:$8 sps:$4 sm:$0xff]  }
 0x1b3   :  { %v4828_v61 = vld [vmem:[%s6359_s5 + $0xf0] ss:$8 sps:$4 sm:$0xff]  }
 0x1b4   :  { %v4181_v8 = vpop.f32.mrf.mxu0 }
 0x1b5   :  { %4267 = vmatpush3.bf16.msra.mxu0 %v4782_v58  ;;  %v4182_v4 = vadd.f32 %v4181_v8, %v4180_v60  ;;  %v4827_v58 = vld [vmem:[%s6359_s5 + $0x4] ss:$8 sps:$4 sm:$0xff]   ;;  %v4825_v60 = vld [vmem:[%s6359_s5] ss:$8 sps:$4 sm:$0xff]  }
 0x1b6   :  { %v4183_v63 = vpop.f32.mrf.mxu0  ;;  %4268 = vmatprep.subr.bf16.mxu0 %v4783_v41  ;;  %v4830_v41 = vld [vmem:[%s6359_s5 + $0xf4] ss:$8 sps:$4 sm:$0xff]   ;;  %v4833_v8 = vld [vmem:[%s6359_s5 + $0xe4] ss:$8 sps:$4 sm:$0xff]  }
 0x1b7   :  { %v2030_v6 = vadd.f32 %v4182_v4, %v359_v3  ;;  %v4836_v63 = vld [vmem:[%s6359_s5 + $0xd4] ss:$8 sps:$4 sm:$0xff]   ;;  %v4834_v3 = vld [vmem:[%s6359_s5 + $0xd0] ss:$8 sps:$4 sm:$0xff]   ;;  %v4839_v4 = vld [vmem:[%s6359_s5 + $0xc4] ss:$8 sps:$4 sm:$0xff]  }
 0x1b8   :  { %v4184_v0 = vpop.f32.mrf.mxu0 }
 0x1b9   :  { %4269 = vmatpush3.bf16.msra.mxu0 %v4784_v13  ;;  %v2070_v10 = vadd.f32 %v4204_v20, %v2030_v6  ;;  %v4831_v13 = vld [vmem:[%s6359_s5 + $0xe0] ss:$8 sps:$4 sm:$0xff]   ;;  %v4852_v0 = vld [vmem:[%s6359_s5 + $0x130] ss:$8 sps:$4 sm:$0xff]   ;;  %v4842_v20 = vld [vmem:[%s6359_s5 + $0xb4] ss:$8 sps:$4 sm:$0xff]  }
 0x1ba   :  { %3400 = vmatprep.subr.bf16.mxu0 %v4854_v1  ;;  %v4837_v6 = vld [vmem:[%s6359_s5 + $0xc0] ss:$8 sps:$4 sm:$0xff]  }
 0x1bc   :  { %3042 = vmatmul.mubr.bf16.vlgmr.msra.gmra.mxu0 %v2162_v36  ;;  %v4803_v36 = vld [vmem:[%s6357_s3 + $0x308] ss:$0 sps:$4 sm:$0xff]  }
 0x1bd   :  { %3424 = vmatprep.mubr.bf16.mxu0 %v4909_v19  ;;  %v2844_v37 = vsel %vm2836_vm2, %v4803_v36, 0  ;;  %3401 = vmatpush1.bf16.msra.mxu0 %v4852_v0  ;;  %v4864_v0 = vld [vmem:[%s6361_s7 + $0x38] sm:$0xff]  }
 0x1d2   :  { %v4224_v7 = vpop.f32.mrf.mxu0 }
 0x1d4   :  { %v4225_v9 = vpop.f32.mrf.mxu0 }
 0x1d5   :  { %v4226_v11 = vadd.f32 %v4225_v9, %v4224_v7  ;;  %v4840_v7 = vld [vmem:[%s6359_s5 + $0xb0] ss:$8 sps:$4 sm:$0xff]   ;;  %v4845_v9 = vld [vmem:[%s6359_s5 + $0xa4] ss:$8 sps:$4 sm:$0xff]  }
 0x1d6   :  { %v4227_v12 = vpop.f32.mrf.mxu0 }
 0x1d7   :  { %v2110_v5 = vadd.f32 %v4226_v11, %v2070_v10  ;;  %v4843_v10 = vld [vmem:[%s6359_s5 + $0xa0] ss:$8 sps:$4 sm:$0xff]   ;;  %v4848_v11 = vld [vmem:[%s6359_s5 + $0x94] ss:$8 sps:$4 sm:$0xff]   ;;  %v4846_v12 = vld [vmem:[%s6359_s5 + $0x90] ss:$8 sps:$4 sm:$0xff]  }
 0x1d8   :  { %v4228_v14 = vpop.f32.mrf.mxu0 }
 0x1d9   :  { %v2150_v15 = vadd.f32 %v2149_v53, %v2110_v5  ;;  %v4851_v5 = vld [vmem:[%s6359_s5 + $0x84] ss:$8 sps:$4 sm:$0xff]   ;;  %v4849_v14 = vld [vmem:[%s6359_s5 + $0x80] ss:$8 sps:$4 sm:$0xff]  }
 0x1db   :  { %v2159_v16 = vmax.f32 %v2150_v15, 0.0  ;;  %v4857_v15 = vld [vmem:[%s6359_s5 + $0x124] ss:$8 sps:$4 sm:$0xff]  }
 0x1dc   :  { %3402 = vmatprep.subr.bf16.mxu0 %v4857_v15  ;;  %v4877_v15 = vld [vmem:[%s6361_s7 + $0x48] sm:$0xff]  }
 0x1dd   :  { %v2164_v18 = vpack.c.bf16 %v2159_v16, %v2159_v16  ;;  %v4855_v16 = vld [vmem:[%s6359_s5 + $0x120] ss:$8 sps:$4 sm:$0xff]  }
 0x1de   :  { %3403 = vmatpush1.bf16.msra.mxu0 %v4855_v16  ;;  %v4878_v16 = vld [vmem:[%s6361_s7 + $0x40] sm:$0xff]  }
 0x1df   :  { %4094 = vmatmul.mubr.msk.bf16.vlgmr.msra.gmra.mxu1 %vm2832_vm3, %v2164_v18 }
 0x1e0   :  { %4233 = vmatpush3.bf16.msra.mxu1 %v4788_v17  ;;  %3001 = vmatprep.mubr.bf16.mxu1 %v5987_v45  ;;  %v4794_v45 = vld [vmem:[%s6357_s3 + $0x68] ss:$12 sps:$4 sm:$0xff]  }
 0x1e1   :  { %4234 = vmatprep.subr.bf16.mxu1 %v4789_v21  ;;  %v4860_v17 = vld [vmem:[%s6359_s5 + $0x114] ss:$8 sps:$4 sm:$0xff]   ;;  %v4863_v21 = vld [vmem:[%s6359_s5 + $0x104] ss:$8 sps:$4 sm:$0xff]  }
 0x1e2   :  { %3404 = vmatprep.subr.bf16.mxu0 %v4860_v17  ;;  %v4879_v17 = vld [vmem:[%s6363_s9 + $0x38] ss:$0 sps:$4 sm:$0xff]  }
 0x1e4   :  { %4235 = vmatpush3.bf16.msra.mxu1 %v4790_v23  ;;  %v4861_v23 = vld [vmem:[%s6359_s5 + $0x100] ss:$8 sps:$4 sm:$0xff]  }
 0x1e5   :  { %4236 = vmatprep.subr.bf16.mxu1 %v4791_v24  ;;  %v2295_v24 = vld [vmem:[%s6358_s4] sm:$0x7]  ;;  %s4912_s4 = smov [#allocation2]  }
 0x1e8   :  { %4237 = vmatpush3.bf16.msra.mxu1 %v4792_v25  ;;  %v2300_v25 = vrot.slane %v2295_v24, %v5788_v22 }
 0x1e9   :  { %4238 = vmatprep.subr.bf16.mxu1 %v4793_v27  ;;  %v2304_v27 = vrot.slane %v2295_v24, %v5800_v26 }
 0x1ec   :  { %4239 = vmatpush3.bf16.msra.mxu1 %v4794_v45 }
 0x1ed   :  { %4240 = vmatprep.subr.bf16.mxu1 %v4795_v28 }
 0x1f0   :  { %4241 = vmatpush3.bf16.msra.mxu1 %v4796_v29 }
 0x1f1   :  { %4242 = vmatprep.subr.bf16.mxu1 %v4797_v30 }
 0x1f4   :  { %4243 = vmatpush3.bf16.msra.mxu1 %v4798_v32 }
 0x1f5   :  { %4244 = vmatprep.subr.bf16.mxu1 %v4799_v33 }
 0x1f8   :  { %4245 = vmatpush3.bf16.msra.mxu1 %v4800_v34 }
 0x1f9   :  { %4246 = vmatprep.subr.bf16.mxu1 %v4801_v35 }
 0x1fc   :  { %4247 = vmatpush3.bf16.msra.mxu1 %v4802_v52 }
 0x1fd   :  { %4293 = vmatprep.subr.bf16.mxu1 %v4910_v59 }
 0x1ff   :  { %3002 = vmatmul.mubr.bf16.vlgmr.msra.gmra.mxu1 %v5989_v62  ;;  %v4807_v62 = vld [vmem:[%s6359_s5 + $0x60] ss:$8 sps:$4 sm:$0xff]  }
 0x200   :  { %4294 = vmatpush3.bf16.msra.mxu1 %v2844_v37  ;;  %4295 = vmatprep.mubr.msk.bf16.mxu1 %vm4911_vm1, %v4910_v59 }
 0x201   :  { %3351 = vmatprep.subr.bf16.mxu1 %v4806_v38 }
 0x207   :  { %4296 = vmatmul.mubr.msk.bf16.vlgmr.msra.gmra.mxu1 %vm2832_vm3, %v2164_v18  ;;  %v4858_v18 = vld [vmem:[%s6359_s5 + $0x110] ss:$8 sps:$4 sm:$0xff]  }
 0x208   :  { %3352 = vmatpush1.bf16.msra.mxu1 %v4804_v39  ;;  %3405 = vmatpush1.bf16.msra.mxu0 %v4858_v18  ;;  %v3682_v18 = vsel %vm2836_vm2, %v4879_v17, 0 }
 0x209   :  { %3353 = vmatprep.subr.bf16.mxu1 %v4809_v40  ;;  %3406 = vmatprep.subr.bf16.mxu0 %v4863_v21  ;;  %v4880_v21 = vld [vmem:[%s6363_s9 + $0x30] sm:$0xff]  }
 0x20c   :  { %3354 = vmatpush1.bf16.msra.mxu1 %v4807_v62  ;;  %3407 = vmatpush1.bf16.msra.mxu0 %v4861_v23  ;;  %v4882_v23 = vld [vmem:[%s6363_s9 + $0x20] sm:$0xff]  }
 0x20d   :  { %3355 = vmatprep.subr.bf16.mxu1 %v4812_v42  ;;  %3568 = vmatprep.subr.bf16.mxu0 %v4909_v19 }
 0x210   :  { %3356 = vmatpush1.bf16.msra.mxu1 %v4810_v43 }
 0x211   :  { %3357 = vmatprep.subr.bf16.mxu1 %v4815_v44 }
 0x214   :  { %v6139_v47 = vpop.f32.mrf.mxu1  ;;  %3358 = vmatpush1.bf16.msra.mxu1 %v4813_v48 }
 0x215   :  { %3359 = vmatprep.subr.bf16.mxu1 %v4818_v46  ;;  %v2881_v45 = vadd.f32 %v6139_v47, %v2300_v25  ;;  %v4884_v25 = vld [vmem:[%s6363_s9 + $0x10] sm:$0xff]  }
 0x216   :  { %v6147_v51 = vpop.f32.mrf.mxu1 }
 0x217   :  { %v2883_v29 = vadd.f32 %v6147_v51, %v2304_v27 }
 0x218   :  { %v2884_v53 = vpop.f32.mrf.mxu1  ;;  %3360 = vmatpush1.bf16.msra.mxu1 %v4816_v49 }
 0x219   :  { %3361 = vmatprep.subr.bf16.mxu1 %v4821_v50  ;;  %v2308_v53 = vrot.slane %v2295_v24, %v350_v2  ;;  %v4866_v2 = vld [vmem:[%s6361_s7 + $0x28] sm:$0xff]   ;;  %v4883_v24 = vld [vmem:[%s6363_s9 + $0x18] sm:$0xff]  }
 0x21a   :  { %v2885_v56 = vpop.f32.mrf.mxu1 }
 0x21c   :  { %3362 = vmatpush1.bf16.msra.mxu1 %v4819_v54 }
 0x21d   :  { %3363 = vmatprep.subr.bf16.mxu1 %v4824_v55 }
 0x220   :  { %3364 = vmatpush1.bf16.msra.mxu1 %v4822_v57 }
 0x221   :  { %3365 = vmatprep.subr.bf16.mxu1 %v4827_v58 }
 0x224   :  { %3366 = vmatpush1.bf16.msra.mxu1 %v4825_v60 }
 0x225   :  { %3367 = vmatprep.subr.bf16.mxu1 %v4830_v41 }
 0x228   :  { %3368 = vmatpush2.bf16.msra.mxu1 %v4828_v61 }
 0x229   :  { %3369 = vmatprep.subr.bf16.mxu1 %v4833_v8 }
 0x22c   :  { %3370 = vmatpush2.bf16.msra.mxu1 %v4831_v13 }
 0x22d   :  { %3371 = vmatprep.subr.bf16.mxu1 %v4836_v63 }
 0x230   :  { %3372 = vmatpush2.bf16.msra.mxu1 %v4834_v3 }
 0x231   :  { %3373 = vmatprep.subr.bf16.mxu1 %v4839_v4  ;;  %v4867_v4 = vld [vmem:[%s6361_s7 + $0x20] sm:$0xff]  }
 0x234   :  { %3374 = vmatpush2.bf16.msra.mxu1 %v4837_v6  ;;  %v4868_v6 = vld [vmem:[%s6361_s7 + $0x18] sm:$0xff]  }
 0x235   :  { %3375 = vmatprep.subr.bf16.mxu1 %v4842_v20  ;;  %v4869_v20 = vld [vmem:[%s6361_s7 + $0x10] sm:$0xff]  }
 0x238   :  { %3376 = vmatpush2.bf16.msra.mxu1 %v4840_v7  ;;  %v4870_v7 = vld [vmem:[%s6361_s7 + $0x8] sm:$0xff]  }
 0x239   :  { %3377 = vmatprep.subr.bf16.mxu1 %v4845_v9  ;;  %v4871_v9 = vld [vmem:[%s6361_s7] sm:$0xff]  }
 0x23c   :  { %3378 = vmatpush2.bf16.msra.mxu1 %v4843_v10  ;;  %v4872_v10 = vld [vmem:[%s6361_s7 + $0x70] sm:$0xff]  }
 0x23d   :  { %3379 = vmatprep.subr.bf16.mxu1 %v4848_v11  ;;  %v4873_v11 = vld [vmem:[%s6361_s7 + $0x68] sm:$0xff]  }
 0x240   :  { %3380 = vmatpush2.bf16.msra.mxu1 %v4846_v12  ;;  %v4874_v12 = vld [vmem:[%s6361_s7 + $0x60] sm:$0xff]  }
 0x241   :  { %3381 = vmatprep.subr.bf16.mxu1 %v4851_v5  ;;  %v4875_v5 = vld [vmem:[%s6361_s7 + $0x58] sm:$0xff]  }
 0x244   :  { %3382 = vmatpush2.bf16.msra.mxu1 %v4849_v14  ;;  %v4876_v14 = vld [vmem:[%s6361_s7 + $0x50] sm:$0xff]  }
 0x245   :  { %4299 = vmatprep.subr.bf16.mxu1 %v4910_v59 }
 0x25c   :  { %v2921_v28 = vpop.f32.mrf.mxu0 }
 0x25d   :  { %v2922_v30 = vadd.f32 %v2921_v28, %v2881_v45 }
 0x25e   :  { %v2923_v32 = vpop.f32.mrf.mxu0 }
 0x25f   :  { %v2924_v33 = vadd.f32 %v2923_v32, %v2883_v29 }
 0x260   :  { %v2925_v34 = vpop.f32.mrf.mxu0 }
 0x262   :  { %v2926_v35 = vpop.f32.mrf.mxu0 }
 0x27c   :  { %v4270_v52 = vpop.f32.mrf.mxu0 }
 0x27e   :  { %v4271_v36 = vpop.f32.mrf.mxu0 }
 0x27f   :  { %v4272_v37 = vadd.f32 %v4271_v36, %v4270_v52 }
 0x280   :  { %v4273_v38 = vpop.f32.mrf.mxu0 }
 0x282   :  { %v4274_v39 = vpop.f32.mrf.mxu0 }
 0x29f   :  { %v2962_v40 = vpop.f32.mrf.mxu1 }
 0x2a0   :  { %v2963_v62 = vadd.f32 %v2962_v40, %v2922_v30  ;;  %v3135_v30 = vld [vmem:[%s6360_s6] sm:$0x3] }
 0x2a1   :  { %v2964_v42 = vpop.f32.mrf.mxu1  ;;  %v3140_v32 = vrot.slane %v3135_v30, %v5788_v22  ;;  %v4885_v22 = vld [vmem:[%s6363_s9 + $0x8] sm:$0xff]  }
 0x2a2   :  { %v2965_v43 = vadd.f32 %v2964_v42, %v2924_v33  ;;  %v3089_v44 = vmax.f32 %v2963_v62, 0.0  ;;  %v3144_v33 = vrot.slane %v3135_v30, %v5800_v26  ;;  %v4886_v26 = vld [vmem:[%s6363_s9] sm:$0xff]  }
 0x2a3   :  { %v2966_v48 = vpop.f32.mrf.mxu1 }
 0x2a4   :  { %v3090_v46 = vmax.f32 %v2965_v43, 0.0  ;;  %v3092_v50 = vpack.c.bf16 %v3089_v44, %v3089_v44  ;;  %v4137_v48 = vld [vmem:[%s6362_s8] ss:$0 sm:$0xff] }
 0x2a5   :  { %v2967_v47 = vpop.f32.mrf.mxu1 }
 0x2a6   :  { %v3093_v49 = vpack.c.bf16 %v3090_v46, %v3090_v46 }
 0x2a8   :  { %3383 = vmatprep.mubr.bf16.mxu1 %v3093_v49 }
 0x2a9   :  { %3384 = vmatmul.mubr.bf16.vlgmr.msra.gmra.mxu1 %v3092_v50 }
 0x2aa   :  { %4315 = vmatprep.mubr.msk.bf16.mxu1 %vm4911_vm1, %v4910_v59  ;;  %4300 = vmatpush3.bf16.msra.mxu1 %v3682_v18 }
 0x2ab   :  { %4301 = vmatprep.subr.bf16.mxu1 %v4910_v59 }
 0x2ae   :  { %4302 = vmatpush3.bf16.msra.mxu1 %v4880_v21 }
 0x2af   :  { %4303 = vmatprep.subr.bf16.mxu1 %v4910_v59 }
 0x2bf   :  { %v4248_v51 = vpop.f32.mrf.mxu1 }
 0x2c1   :  { %v4249_v54 = vpop.f32.mrf.mxu1 }
 0x2c2   :  { %v4250_v55 = vadd.f32 %v4249_v54, %v4248_v51 }
 0x2c3   :  { %v4251_v56 = vpop.f32.mrf.mxu1 }
 0x2c4   :  { %v3004_v57 = vadd.f32 %v4250_v55, %v2308_v53 }
 0x2c5   :  { %v4252_v58 = vpop.f32.mrf.mxu1 }
 0x2c6   :  { %v3044_v60 = vadd.f32 %v4272_v37, %v3004_v57 }
 0x2c7   :  { %v3083_v41 = vpop.f32.mrf.mxu1 }
 0x2c8   :  { %v3084_v61 = vadd.f32 %v3083_v41, %v3044_v60 }
 0x2c9   :  { %v4297_v8 = vpop.f32.mrf.mxu1 }
 0x2ca   :  { %v3091_v13 = vmax.f32 %v3084_v61, 0.0 }
 0x2cb   :  { %v3086_v63 = vpop.f32.mrf.mxu1 }
 0x2cc   :  { %v3094_v1 = vpack.c.bf16 %v3091_v13, %v3091_v13 }
 0x2cd   :  { %v4298_v3 = vpop.f32.mrf.mxu1 }
 0x2ce   :  { %4136 = vmatmul.mubr.msk.bf16.vlgmr.msra.gmra.mxu0 %vm3347_vm4, %v3094_v1 }
 0x2cf   :  { %3569 = vmatpush1.bf16.msra.mxu0 %v4864_v0 }
 0x2d0   :  { %3570 = vmatprep.subr.bf16.mxu0 %v4909_v19 }
 0x2d3   :  { %3571 = vmatpush1.bf16.msra.mxu0 %v4865_v31 }
 0x2d4   :  { %3572 = vmatprep.subr.bf16.mxu0 %v4909_v19 }
 0x2d7   :  { %3573 = vmatpush1.bf16.msra.mxu0 %v4866_v2 }
 0x2d8   :  { %3574 = vmatprep.subr.bf16.mxu0 %v4909_v19 }
 0x2db   :  { %3575 = vmatpush1.bf16.msra.mxu0 %v4867_v4 }
 0x2dc   :  { %3576 = vmatprep.subr.bf16.mxu0 %v4909_v19 }
 0x2df   :  { %3577 = vmatpush1.bf16.msra.mxu0 %v4868_v6 }
 0x2e0   :  { %3578 = vmatprep.subr.bf16.mxu0 %v4909_v19 }
 0x2e3   :  { %3579 = vmatpush1.bf16.msra.mxu0 %v4869_v20 }
 0x2e4   :  { %3580 = vmatprep.subr.bf16.mxu0 %v4909_v19 }
 0x2e7   :  { %3581 = vmatpush1.bf16.msra.mxu0 %v4870_v7 }
 0x2e8   :  { %3582 = vmatprep.subr.bf16.mxu0 %v4909_v19 }
 0x2eb   :  { %3583 = vmatpush1.bf16.msra.mxu0 %v4871_v9 }
 0x2ec   :  { %3586 = vmatprep.subr.bf16.mxu0 %v4909_v19 }
 0x2ef   :  { %3587 = vmatpush2.bf16.msra.mxu0 %v4872_v10 }
 0x2f0   :  { %3588 = vmatprep.subr.bf16.mxu0 %v4909_v19 }
 0x2f3   :  { %3589 = vmatpush2.bf16.msra.mxu0 %v4873_v11 }
 0x2f4   :  { %3590 = vmatprep.subr.bf16.mxu0 %v4909_v19 }
 0x2f7   :  { %3591 = vmatpush2.bf16.msra.mxu0 %v4874_v12 }
 0x2f8   :  { %3592 = vmatprep.subr.bf16.mxu0 %v4909_v19 }
 0x2fb   :  { %3593 = vmatpush2.bf16.msra.mxu0 %v4875_v5 }
 0x2fc   :  { %3594 = vmatprep.subr.bf16.mxu0 %v4909_v19 }
 0x2ff   :  { %3595 = vmatpush2.bf16.msra.mxu0 %v4876_v14 }
 0x300   :  { %3596 = vmatprep.subr.bf16.mxu0 %v4909_v19 }
 0x303   :  { %3597 = vmatpush2.bf16.msra.mxu0 %v4877_v15 }
 0x304   :  { %3598 = vmatprep.subr.bf16.mxu0 %v4909_v19  ;;  %v4881_v19 = vld [vmem:[%s6363_s9 + $0x28] sm:$0xff]   ;;  %s3731_s9 = sshll.u32 %s4912_s4, 4  ;;  %s3732_s9 = int_to_ptr.vmem [resolvable:$true] %s3731_s9 }
 0x305   :  { %4304 = vmatpush3.bf16.msra.mxu1 %v4881_v19  ;;  %s4887_s8 = scalar_lea.vmem %s3732_s9, 128  ;;  %p4892_p1 = scmp.lt.s32.totalorder %s3732_s9, %s3732_s9 }
 0x306   :  { %4305 = vmatprep.subr.bf16.mxu1 %v4910_v59  ;;  %p4888_p0 = scmp.ne.s32.totalorder %s3732_s9, %s4887_s8  ;;  %p4893_p2 = scmp.lt.s32.totalorder %s4887_s8, %s4887_s8 }
 0x307   :  { %3599 = vmatpush2.bf16.msra.mxu0 %v4878_v16 }
 0x308   :  { %p4894_p3 = por %p4893_p2, %p4892_p1 }
 0x309   :  { %4306 = vmatpush3.bf16.msra.mxu1 %v4882_v23 }
 0x30a   :  { %4307 = vmatprep.subr.bf16.mxu1 %v4910_v59  ;;  %p4895_p4 = pnand %p4894_p3, %p4888_p0 }
 0x30d   :  { %4308 = vmatpush3.bf16.msra.mxu1 %v4883_v24 }
 0x30e   :  { %4309 = vmatprep.subr.bf16.mxu1 %v4910_v59 }
 0x311   :  { %4310 = vmatpush3.bf16.msra.mxu1 %v4884_v25 }
 0x312   :  { %4311 = vmatprep.subr.bf16.mxu1 %v4910_v59 }
 0x315   :  { %4312 = vmatpush3.bf16.msra.mxu1 %v4885_v22 }
 0x316   :  { %4313 = vmatprep.subr.bf16.mxu1 %v4910_v59  ;;  %v4154_v59 = vld [vmem:[%s6364_s10] ss:$0 sm:$0xff] }
 0x319   :  { %4314 = vmatpush3.bf16.msra.mxu1 %v4886_v26 }
 0x369   :  { %v3385_v27 = vpop.f32.mrf.mxu1 }
 0x36a   :  { %v3386_v34 = vadd.f32 %v3385_v27, %v3140_v32 }
 0x36b   :  { %v3387_v45 = vpop.f32.mrf.mxu1 }
 0x36c   :  { %v3388_v52 = vadd.f32 %v3387_v45, %v3144_v33 }
 0x36d   :  { %v3389_v28 = vpop.f32.mrf.mxu1 }
 0x36f   :  { %v3390_v29 = vpop.f32.mrf.mxu1 }
 0x38e   :  { %v3426_v35 = vpop.f32.mrf.mxu0 }
 0x38f   :  { %v3427_v36 = vadd.f32 %v3426_v35, %v3386_v34 }
 0x390   :  { %v3428_v37 = vpop.f32.mrf.mxu0 }
 0x391   :  { %v3429_v38 = vadd.f32 %v3428_v37, %v3388_v52  ;;  %v3433_v39 = vmax.f32 %v3427_v36, 0.0 }
 0x392   :  { %v3430_v40 = vpop.f32.mrf.mxu0 }
 0x393   :  { %v3434_v62 = vmax.f32 %v3429_v38, 0.0  ;;  %v3435_v44 = vpack.c.bf16 %v3433_v39, %v3433_v39 }
 0x394   :  { %v3431_v42 = vpop.f32.mrf.mxu0 }
 0x395   :  { %v3436_v43 = vpack.c.bf16 %v3434_v62, %v3434_v62 }
 0x397   :  { %4153 = vmatprep.mubr.msk.bf16.mxu0 %vm3564_vm5, %v3436_v43 }
 0x398   :  { %3601 = vmatmul.mubr.bf16.vlgmr.msra.gmra.mxu0 %v3435_v44 }
 0x458   :  { %v3602_v46 = vpop.f32.mrf.mxu0 }
 0x459   :  { %v3603_v47 = vadd.f32 %v4137_v48, %v3602_v46 }
 0x45a   :  { %v3604_v49 = vpop.f32.mrf.mxu0 }
 0x45b   :  { %v3608_v50 = vmax.f32 %v3603_v47, 0.0 }
 0x45c   :  { %v3605_v51 = vpop.f32.mrf.mxu0 }
 0x45d   :  { %v3609_v53 = vpack.c.bf16 %v3608_v50, %v3608_v50 }
 0x45e   :  { %v3606_v54 = vpop.f32.mrf.mxu0 }
 0x45f   :  { %4316 = vmatmul.mubr.msk.bf16.vlgmr.msra.gmra.mxu1 %vm3677_vm6, %v3609_v53 }
 0x51f   :  { %v3718_v55 = vpop.f32.mrf.mxu1 }
 0x520   :  { %v3719_v56 = vadd.f32 %v4154_v59, %v3718_v55 }
 0x521   :  { %v4317_v57 = vpop.f32.mrf.mxu1 }
 0x522   :  { %3724 = vst [vmem:[#allocation2] sm:$0xff] %v3719_v56 }
 0x523   :  { %v3721_v58 = vpop.f32.mrf.mxu1 }
 0x524   :  { %4898 = shalt.err (!%p4895_p4)
}
 0x525   :  { %3734 = dma.vmem_to_hbm [thread:$0]  %s3732_s9, 128, %s6365_s11, [#allocation3]   ;;  %v4318_v60 = vpop.f32.mrf.mxu1 }
 0x526   :  { %4907 = dma.done.wait [#allocation3], 128  }
 0x527   :  { %4908 = vsyncadd [#allocation3], 4294967168 }
 0x528   :  { %3738 = vsyncpa [#allocation3], 1 }

</bundles_post_ra>
